<compile_context>
chip_gen: v7x
topology: tpu7x:2x2x1
jax: 0.10.0
libtpu: 0.0.40
codegen_flags: <defaults>
</compile_context>

<pallas_src>
import math

import jax
import jax.numpy as jnp
from jax.experimental import pallas as pl
from jax.experimental.pallas import tpu as pltpu

N_EMBED = 384     # n_embed from the module
HEAD_SIZE = 64
BLOCK_SIZE = 256  # causal mask buffer size in the module (mask applied for T <= block_size)

_LANE = 128       # TPU lane width; pad each of Q/K/V to a full lane tile
_ROW_TARGET = 512 # target Bblk*T matmul rows per grid step (fills 256-wide MXU)


def _head_kernel(x_ref, w_ref, o_ref):
    # x_ref: (Bblk, T, C) bf16 slab; w_ref: (C, 3*Hp) bf16 fused [Q*scale|K|V],
    # each head zero-padded to Hp=128 lanes.  o_ref: (Bblk, T, Hp) f32.
    Bblk, T, C = x_ref.shape
    Hp = w_ref.shape[1] // 3

    # Fused QKV projection: fold batch into the M dimension so the MXU sees a
    # (Bblk*T, C) x (C, 3*Hp) matmul.  bf16 operands, f32 accumulation.
    x = x_ref[...].reshape(Bblk * T, C)
    qkv = jnp.dot(x, w_ref[...], preferred_element_type=jnp.float32)  # (Bblk*T, 3Hp)
    qkv = qkv.reshape(Bblk, T, 3 * Hp)

    # Lane-tile-aligned slices (offsets 0 / Hp / 2*Hp, each Hp=128 wide).
    # Scale is already folded into the query weight columns.
    q = qkv[:, :, 0 * Hp:1 * Hp].astype(jnp.bfloat16)                 # (Bblk, T, Hp)
    k = qkv[:, :, 1 * Hp:2 * Hp].astype(jnp.bfloat16)
    v = qkv[:, :, 2 * Hp:3 * Hp].astype(jnp.bfloat16)

    # wei = (q*scale) @ k^T, batched over Bblk.  Zero-padded columns of q/k
    # contribute nothing, so this equals the unpadded 64-dim contraction.
    scores = jnp.einsum('bqh,bkh->bqk', q, k,
                        preferred_element_type=jnp.float32)           # (Bblk, T, T)

    # causal mask (tril): position j attends only to positions <= j
    row = jax.lax.broadcasted_iota(jnp.int32, (T, T), 0)
    col = jax.lax.broadcasted_iota(jnp.int32, (T, T), 1)
    scores = jnp.where((col <= row)[None, :, :], scores, -jnp.inf)

    # numerically stable softmax along the last axis (f32 math)
    m = jnp.max(scores, axis=-1, keepdims=True)
    p = jnp.exp(scores - m)
    wei = p * pl.reciprocal(jnp.sum(p, axis=-1, keepdims=True), approx=True)

    # dropout: identity (eval mode)

    # out = wei @ v, padded to Hp lanes -> unmasked, lane-dense stores.
    out = jnp.einsum('bqk,bkh->bqh', wei.astype(jnp.bfloat16), v,
                     preferred_element_type=jnp.float32)              # (Bblk, T, Hp)
    o_ref[...] = out.astype(o_ref.dtype)


def _num_tensorcores():
    """Best-effort TensorCore count per chip: v7x has 2, earlier gens have 1."""
    try:
        kind = jax.devices()[0].device_kind.lower()
    except Exception:
        return 1
    return 2 if ("v7" in kind or "7x" in kind) else 1


def _pick_bblk(B, T, row_target, num_cores):
    """Largest divisor of B with Bblk*T <= row_target rows per step.

    On multi-TensorCore chips (v7x) keep >= num_cores grid steps when the
    batch allows it so every core gets work; on single-TC chips the grid is a
    serial loop, so the single largest slab wins (less per-step overhead).
    """
    divisors = [d for d in range(1, B + 1) if B % d == 0]
    fits = [d for d in divisors if d * T <= row_target] or [1]
    if num_cores >= 2:
        multi = [d for d in fits if B // d >= num_cores]
        if multi:
            return max(multi)
    return max(fits)


def head_forward(x, w_key, w_query, w_value):
    """x: (B, T, C); w_*: (C, H) (already transposed from PyTorch's (H, C))."""
    B, T, C = x.shape
    H = w_key.shape[1]
    scale = C ** (-0.5)          # module scales by C**-0.5 (n_embed), kept as-is
    Hp = ((H + _LANE - 1) // _LANE) * _LANE  # pad each head to a full lane tile

    def _pad(w):
        return jnp.pad(w, ((0, 0), (0, Hp - H)))

    # Fused, lane-padded QKV weight with the softmax scale folded into Q.
    w_fused = jnp.concatenate(
        [_pad(w_query * scale), _pad(w_key), _pad(w_value)], axis=1
    ).astype(jnp.bfloat16)                                            # (C, 3*Hp)

    # bf16 at the pallas_call boundary: halves DMA bytes, f32 accum in-kernel.
    x_bf16 = x.astype(jnp.bfloat16)

    bblk = _pick_bblk(B, T, _ROW_TARGET, _num_tensorcores())
    grid = (B // bblk,)

    out_padded = pl.pallas_call(
        _head_kernel,
        out_shape=jax.ShapeDtypeStruct((B, T, Hp), jnp.float32),
        grid_spec=pltpu.PrefetchScalarGridSpec(
            num_scalar_prefetch=0,
            grid=grid,
            in_specs=[
                pl.BlockSpec((bblk, T, C), lambda b: (b, 0, 0)),
                pl.BlockSpec((C, 3 * Hp), lambda b: (0, 0)),
            ],
            out_specs=pl.BlockSpec((bblk, T, Hp), lambda b: (b, 0, 0)),
        ),
        compiler_params=pltpu.CompilerParams(
            dimension_semantics=("parallel",)),
    )(x_bf16, w_fused)

    # Drop the zero-padded head columns.
    return out_padded[:, :, :H]


def head_reference(x, w_key, w_query, w_value):
    """Plain-JAX reference mirroring the PyTorch forward (eval mode)."""
    B, T, C = x.shape
    hp = jax.lax.Precision.HIGHEST
    k = jnp.einsum("btc,ch->bth", x, w_key, precision=hp)
    q = jnp.einsum("btc,ch->bth", x, w_query, precision=hp)
    v = jnp.einsum("btc,ch->bth", x, w_value, precision=hp)
    wei = jnp.einsum("bth,bsh->bts", q, k, precision=hp) * C ** (-0.5)
    mask = jnp.tril(jnp.ones((T, T), dtype=bool))
    wei = jnp.where(mask, wei, -jnp.inf)
    wei = jax.nn.softmax(wei, axis=-1)
    return jnp.einsum("bts,bsh->bth", wei, v, precision=hp)


if __name__ == "__main__":
    # Small shapes consistent with the module; B*T = 256 matmul rows total so a
    # single-TC chip runs one big step and a 2-TC chip splits it into 2 steps.
    B, T, C, H = 8, 32, N_EMBED, HEAD_SIZE
    assert T <= BLOCK_SIZE

    key = jax.random.PRNGKey(0)
    kx, kk, kq, kv = jax.random.split(key, 4)

    x = jax.random.normal(kx, (B, T, C), dtype=jnp.float32)

    # nn.Linear(n_embed, head_size, bias=False): weight ~ U(-1/sqrt(C), 1/sqrt(C)),
    # stored transposed here as (C, H) so the kernel does x @ W.
    bound = 1.0 / math.sqrt(C)
    w_key = jax.random.uniform(kk, (C, H), jnp.float32, -bound, bound)
    w_query = jax.random.uniform(kq, (C, H), jnp.float32, -bound, bound)
    w_value = jax.random.uniform(kv, (C, H), jnp.float32, -bound, bound)

    out = head_forward(x, w_key, w_query, w_value)
    out = jax.block_until_ready(out)

    ref = head_reference(x, w_key, w_query, w_value)
    assert out.shape == (B, T, H)
    assert jnp.allclose(out, ref, rtol=2e-2, atol=2e-2), "mismatch vs reference"

    print("KERNEL_OK")
</pallas_src>

<mosaic_0001>
module attributes {stable_mosaic.version = 11 : i64} {
  func.func @_head_kernel(%arg0: i32, %arg1: memref<8x32x384xbf16, #tpu.memory_space<vmem>>, %arg2: memref<384x384xbf16, #tpu.memory_space<vmem>>, %arg3: memref<8x32x128xf32, #tpu.memory_space<vmem>>) attributes {dimension_semantics = [#tpu.dimension_semantics<parallel>], iteration_bounds = array<i64: 1>, scalar_prefetch = 0 : i64, scratch_operands = 0 : i64, tpu.core_type = #tpu.core_type<tc>, window_params = [{transform_indices = @transform_0, window_bounds = array<i64: 8, 32, 384>}, {pipeline_mode = #tpu.pipeline_mode<synchronous>, transform_indices = @transform_1, window_bounds = array<i64: 384, 384>}, {transform_indices = @transform_2, window_bounds = array<i64: 8, 32, 128>}]} {
    %c0 = arith.constant 0 : index
    %c0_0 = arith.constant 0 : index
    %c0_1 = arith.constant 0 : index
    %0 = vector.load %arg1[%c0, %c0_0, %c0_1] : memref<8x32x384xbf16, #tpu.memory_space<vmem>>, vector<8x32x384xbf16>
    %1 = vector.shape_cast %0 : vector<8x32x384xbf16> to vector<256x384xbf16>
    %c0_2 = arith.constant 0 : index
    %c0_3 = arith.constant 0 : index
    %2 = vector.load %arg2[%c0_2, %c0_3] : memref<384x384xbf16, #tpu.memory_space<vmem>>, vector<384x384xbf16>
    %cst = arith.constant dense<0.000000e+00> : vector<256x384xf32>
    %3 = tpu.matmul %1, %2, %cst {dimension_numbers = #tpu.dot_dimension_numbers<[1], [0], [0], [1], [0, 0, 1, 1], [], []>} : vector<256x384xbf16>, vector<384x384xbf16>, vector<256x384xf32> -> vector<256x384xf32>
    %4 = vector.shape_cast %3 : vector<256x384xf32> to vector<8x32x384xf32>
    %5 = vector.extract_strided_slice %4 {offsets = [0, 0, 0], sizes = [8, 32, 128], strides = [1, 1, 1]} : vector<8x32x384xf32> to vector<8x32x128xf32>
    %6 = arith.truncf %5 : vector<8x32x128xf32> to vector<8x32x128xbf16>
    %7 = vector.extract_strided_slice %4 {offsets = [0, 0, 128], sizes = [8, 32, 128], strides = [1, 1, 1]} : vector<8x32x384xf32> to vector<8x32x128xf32>
    %8 = arith.truncf %7 : vector<8x32x128xf32> to vector<8x32x128xbf16>
    %9 = vector.extract_strided_slice %4 {offsets = [0, 0, 256], sizes = [8, 32, 128], strides = [1, 1, 1]} : vector<8x32x384xf32> to vector<8x32x128xf32>
    %10 = arith.truncf %9 : vector<8x32x128xf32> to vector<8x32x128xbf16>
    "tpu.trace_start"() <{level = 10 : i32, message = "bqh,bkh->bqk"}> : () -> ()
    %cst_4 = arith.constant dense<0.000000e+00> : vector<8x32x32xf32>
    %11 = tpu.matmul %6, %8, %cst_4 {dimension_numbers = #tpu.dot_dimension_numbers<[2], [2], [1], [1], [0, 0, 0, 1, 1, 1], [0], [0]>} : vector<8x32x128xbf16>, vector<8x32x128xbf16>, vector<8x32x32xf32> -> vector<8x32x32xf32>
    "tpu.trace_stop"() : () -> ()
    %12 = tpu.iota {dimensions = array<i32: 0>} : vector<32x32xi32>
    %13 = tpu.iota {dimensions = array<i32: 1>} : vector<32x32xi32>
    %14 = arith.cmpi sle, %13, %12 : vector<32x32xi32>
    %15 = vector.shape_cast %14 : vector<32x32xi1> to vector<1x32x32xi1>
    %cst_5 = arith.constant 0xFF800000 : f32
    %16 = vector.shape_cast %15 : vector<1x32x32xi1> to vector<1x32x32xi1>
    %17 = vector.broadcast %16 : vector<1x32x32xi1> to vector<8x32x32xi1>
    %18 = vector.broadcast %cst_5 : f32 to vector<8x32x32xf32>
    %19 = arith.select %17, %11, %18 : vector<8x32x32xi1>, vector<8x32x32xf32>
    %cst_6 = arith.constant dense<0xFF800000> : vector<8x32xf32>
    %20 = vector.multi_reduction <maximumf>, %19, %cst_6 [2] : vector<8x32x32xf32> to vector<8x32xf32>
    %21 = vector.shape_cast %20 : vector<8x32xf32> to vector<8x32x1xf32>
    %22 = vector.broadcast %21 : vector<8x32x1xf32> to vector<8x32x32xf32>
    %23 = arith.subf %19, %22 : vector<8x32x32xf32>
    %24 = math.exp %23 : vector<8x32x32xf32>
    %cst_7 = arith.constant dense<0.000000e+00> : vector<8x32xf32>
    %25 = vector.multi_reduction <add>, %24, %cst_7 [2] : vector<8x32x32xf32> to vector<8x32xf32>
    %26 = vector.shape_cast %25 : vector<8x32xf32> to vector<8x32x1xf32>
    %27 = tpu.reciprocal %26 {approx = true} : vector<8x32x1xf32> -> vector<8x32x1xf32>
    %28 = vector.broadcast %27 : vector<8x32x1xf32> to vector<8x32x32xf32>
    %29 = arith.mulf %24, %28 : vector<8x32x32xf32>
    %30 = arith.truncf %29 : vector<8x32x32xf32> to vector<8x32x32xbf16>
    "tpu.trace_start"() <{level = 10 : i32, message = "bqk,bkh->bqh"}> : () -> ()
    %cst_8 = arith.constant dense<0.000000e+00> : vector<8x32x128xf32>
    %31 = tpu.matmul %30, %10, %cst_8 {dimension_numbers = #tpu.dot_dimension_numbers<[2], [1], [1], [2], [0, 0, 0, 1, 1, 2], [0], [0]>} : vector<8x32x32xbf16>, vector<8x32x128xbf16>, vector<8x32x128xf32> -> vector<8x32x128xf32>
    "tpu.trace_stop"() : () -> ()
    %c0_9 = arith.constant 0 : index
    %c0_10 = arith.constant 0 : index
    %c0_11 = arith.constant 0 : index
    %32 = vector.load %arg3[%c0_9, %c0_10, %c0_11] : memref<8x32x128xf32, #tpu.memory_space<vmem>>, vector<8x32x128xf32>
    tpu.vector_store %arg3[%c0_9, %c0_10, %c0_11], %31 {strides = array<i32>} : memref<8x32x128xf32, #tpu.memory_space<vmem>>, vector<8x32x128xf32>,
    return
  }
  func.func @transform_0(%arg0: i32) -> (i32, i32, i32) {
    %c0_i32 = arith.constant 0 : i32
    %c0_i32_0 = arith.constant 0 : i32
    %c0_i32_1 = arith.constant 0 : i32
    return %arg0, %c0_i32, %c0_i32_0 : i32, i32, i32
  }
  func.func @transform_1(%arg0: i32) -> (i32, i32) {
    %c0_i32 = arith.constant 0 : i32
    %c0_i32_0 = arith.constant 0 : i32
    %c0_i32_1 = arith.constant 0 : i32
    return %c0_i32, %c0_i32_0 : i32, i32
  }
  func.func @transform_2(%arg0: i32) -> (i32, i32, i32) {
    %c0_i32 = arith.constant 0 : i32
    %c0_i32_0 = arith.constant 0 : i32
    %c0_i32_1 = arith.constant 0 : i32
    return %arg0, %c0_i32, %c0_i32_0 : i32, i32, i32
  }
}

</mosaic_0001>

<bundles_post_ra>
// kernel: tpu_custom_call.1
= control target key start
LH: loop header
LB: loop body
LE: loop exit
PB: predicated region body
PF: predicated region fallthrough
CT: control target
= control target key end

     0   :  { %7 = vsyncpa [#allocation3], 0  ;;  %s4502_s0 = inlined_call_operand.hbm [shape: bf16[8,32,384], index: 0, kind: input, shape index: {}]   ;;  %s4503_s1 = inlined_call_operand.hbm [shape: bf16[384,384], index: 1, kind: input, shape index: {}]   ;;  %s4504_s2 = inlined_call_operand.hbm [shape: f32[8,32,128], index: 2, kind: output, shape index: {}]  }
   0x1   :  { %8 = vsyncpa [#allocation6], 0 }
   0x2   :  { %9 = vsyncpa [#allocation4], 0  ;;  %s3843_s9 = smov [#allocation2]   ;;  %s3771_s13 = scalar_lea.hbm %s4502_s0, 6144 }
   0x3   :  { %s15_s10 = sshll.u32 %s3843_s9, 4  ;;  %p3772_p0 = scmp.ne.s32.totalorder %s4502_s0, %s3771_s13  ;;  %s16_s10 = int_to_ptr.vmem [resolvable:$true] %s15_s10 }
   0x4   :  { %p3775_p1 = scmp.lt.u32.totalorder %s3771_s13, %s4502_s0 }
   0x6   :  { %p3777_p2 = pnand %p3775_p1, %p3772_p0 }
   0x8   :  { %3780 = shalt.err (!%p3777_p2)
}
   0x9   :  { %s3781_s18 = scalar_lea.vmem %s16_s10, 6144  ;;  %p3786_p4 = scmp.lt.s32.totalorder %s16_s10, %s16_s10 }
   0xa   :  { %p3782_p3 = scmp.ne.s32.totalorder %s16_s10, %s3781_s18  ;;  %p3787_p5 = scmp.lt.s32.totalorder %s3781_s18, %s3781_s18 }
   0xc   :  { %p3788_p6 = por %p3787_p5, %p3786_p4 }
   0xe   :  { %p3789_p7 = pnand %p3788_p6, %p3782_p3 }
  0x10   :  { %3792 = shalt.err (!%p3789_p7)
}
  0x11   :  { %s3844_s19 = smov 192   ;;  %s3845_s20 = smov 12  }
  0x12   :  { %21 = dma.hbm_to_vmem [thread:$0]  %s4502_s0, 6144, %s16_s10, [#allocation3], %s3844_s19, %s3844_s19, %s3845_s20  }
  0x13   :  { %s3846_s23 = smov [#allocation5]   ;;  %s3793_s27 = scalar_lea.hbm %s4503_s1, 9216 }
  0x14   :  { %s27_s24 = sshll.u32 %s3846_s23, 4  ;;  %p3794_p8 = scmp.ne.s32.totalorder %s4503_s1, %s3793_s27  ;;  %s28_s24 = int_to_ptr.vmem [resolvable:$true] %s27_s24 }
  0x15   :  { %p3797_p9 = scmp.lt.u32.totalorder %s3793_s27, %s4503_s1 }
  0x17   :  { %p3799_p10 = pnand %p3797_p9, %p3794_p8 }
  0x19   :  { %3802 = shalt.err (!%p3799_p10)
}
  0x1a   :  { %s3803_s4 = scalar_lea.vmem %s28_s24, 9216  ;;  %p3808_p12 = scmp.lt.s32.totalorder %s28_s24, %s28_s24 }
  0x1b   :  { %p3804_p11 = scmp.ne.s32.totalorder %s28_s24, %s3803_s4  ;;  %p3809_p13 = scmp.lt.s32.totalorder %s3803_s4, %s3803_s4 }
  0x1d   :  { %p3810_p0 = por %p3809_p13, %p3808_p12 }
  0x1f   :  { %p3811_p1 = pnand %p3810_p0, %p3804_p11 }
  0x21   :  { %3814 = shalt.err (!%p3811_p1)
}
  0x22   :  { %33 = dma.hbm_to_vmem [thread:$0]  %s4503_s1, 9216, %s28_s24, [#allocation6], %s3844_s19, %s3844_s19, %s3845_s20  }
  0x23   :  { %3837 = dma.done.wait [#allocation3], 6144  }
  0x24   :  { %3838 = vsyncadd [#allocation3], 4294961152 }
  0x25   :  { %3839 = dma.done.wait [#allocation6], 9216  }
  0x26   :  { %3840 = vsyncadd [#allocation6], 4294958080  ;;  %v3483_v0 = vld [vmem:[#allocation5 + $0x4] ss:$12 sps:$4 sm:$0xff]   ;;  %v3485_v1 = vld [vmem:[#allocation5] ss:$12 sps:$4 sm:$0xff]  }
  0x27   :  { %841 = vmatprep.subr.bf16.mxu0 %v3483_v0  ;;  %v3486_v2 = vld [vmem:[#allocation5 + $0x1c] ss:$12 sps:$4 sm:$0xff]   ;;  %v3488_v3 = vld [vmem:[#allocation5 + $0x18] ss:$12 sps:$4 sm:$0xff]   ;;  %v3489_v4 = vld [vmem:[#allocation5 + $0x34] ss:$12 sps:$4 sm:$0xff]  }
  0x28   :  { %842 = vmatpush1.bf16.msra.mxu0 %v3485_v1  ;;  %v3491_v5 = vld [vmem:[#allocation5 + $0x30] ss:$12 sps:$4 sm:$0xff]   ;;  %v3492_v6 = vld [vmem:[#allocation5 + $0x4c] ss:$12 sps:$4 sm:$0xff]   ;;  %v3494_v7 = vld [vmem:[#allocation5 + $0x48] ss:$12 sps:$4 sm:$0xff]  }
  0x29   :  { %843 = vmatprep.subr.bf16.mxu0 %v3486_v2  ;;  %v3495_v8 = vld [vmem:[#allocation5 + $0x64] ss:$12 sps:$4 sm:$0xff]   ;;  %v3497_v9 = vld [vmem:[#allocation5 + $0x60] ss:$12 sps:$4 sm:$0xff]   ;;  %v3498_v10 = vld [vmem:[#allocation5 + $0x7c] ss:$12 sps:$4 sm:$0xff]  }
  0x2a   :  { %v3500_v11 = vld [vmem:[#allocation5 + $0x78] ss:$12 sps:$4 sm:$0xff]   ;;  %v3501_v12 = vld [vmem:[#allocation5 + $0x94] ss:$12 sps:$4 sm:$0xff]   ;;  %v3503_v14 = vld [vmem:[#allocation5 + $0x90] ss:$12 sps:$4 sm:$0xff]  }
  0x2b   :  { %v3533_v13 = vld [vmem:[#allocation2 + $0x4] ss:$12 sps:$4 sm:$0xff]   ;;  %v3504_v15 = vld [vmem:[#allocation5 + $0xac] ss:$12 sps:$4 sm:$0xff]   ;;  %v3506_v16 = vld [vmem:[#allocation5 + $0xa8] ss:$12 sps:$4 sm:$0xff]  }
  0x2c   :  { %844 = vmatpush1.bf16.msra.mxu0 %v3488_v3  ;;  %873 = vmatprep.mubr.bf16.mxu0 %v3533_v13  ;;  %v3507_v17 = vld [vmem:[#allocation5 + $0xc4] ss:$12 sps:$4 sm:$0xff]   ;;  %v3509_v18 = vld [vmem:[#allocation5 + $0xc0] ss:$12 sps:$4 sm:$0xff]   ;;  %v3510_v19 = vld [vmem:[#allocation5 + $0xdc] ss:$12 sps:$4 sm:$0xff]  }
  0x2d   :  { %845 = vmatprep.subr.bf16.mxu0 %v3489_v4  ;;  %1259 = vmatprep.mubr.bf16.mxu1 %v3533_v13  ;;  %v3512_v20 = vld [vmem:[#allocation5 + $0xd8] ss:$12 sps:$4 sm:$0xff]   ;;  %v3513_v21 = vld [vmem:[#allocation5 + $0xf4] ss:$12 sps:$4 sm:$0xff]   ;;  %v3515_v22 = vld [vmem:[#allocation5 + $0xf0] ss:$12 sps:$4 sm:$0xff]  }
  0x2e   :  { %v3516_v23 = vld [vmem:[#allocation5 + $0x10c] ss:$12 sps:$4 sm:$0xff]   ;;  %v3518_v24 = vld [vmem:[#allocation5 + $0x108] ss:$12 sps:$4 sm:$0xff]   ;;  %v3519_v25 = vld [vmem:[#allocation5 + $0x124] ss:$12 sps:$4 sm:$0xff]  }
  0x2f   :  { %v3521_v26 = vld [vmem:[#allocation5 + $0x120] ss:$12 sps:$4 sm:$0xff]   ;;  %v3522_v27 = vld [vmem:[#allocation5 + $0x13c] ss:$12 sps:$4 sm:$0xff]   ;;  %v3524_v28 = vld [vmem:[#allocation5 + $0x138] ss:$12 sps:$4 sm:$0xff]  }
  0x30   :  { %846 = vmatpush1.bf16.msra.mxu0 %v3491_v5  ;;  %v3525_v29 = vld [vmem:[#allocation5 + $0x154] ss:$12 sps:$4 sm:$0xff]   ;;  %v3527_v31 = vld [vmem:[#allocation5 + $0x150] ss:$12 sps:$4 sm:$0xff]   ;;  %v3528_v34 = vld [vmem:[#allocation5 + $0x16c] ss:$12 sps:$4 sm:$0xff]  }
  0x31   :  { %847 = vmatprep.subr.bf16.mxu0 %v3492_v6  ;;  %v3603_v30 = vld [vmem:[#allocation5 + $0xc8] ss:$12 sps:$4 sm:$0xff]   ;;  %v3606_v33 = vld [vmem:[#allocation5 + $0xe0] ss:$12 sps:$4 sm:$0xff]   ;;  %v3572_v37 = vld [vmem:[#allocation5 + $0x184] ss:$12 sps:$4 sm:$0xff]  }
  0x32   :  { %3035 = vmatprep.subr.bf16.mxu1 %v3603_v30  ;;  %v3605_v32 = vld [vmem:[#allocation5 + $0x8] ss:$12 sps:$4 sm:$0xff]   ;;  %v3607_v35 = vld [vmem:[#allocation5 + $0x20] ss:$12 sps:$4 sm:$0xff]   ;;  %v3608_v38 = vld [vmem:[#allocation5 + $0xf8] ss:$12 sps:$4 sm:$0xff]  }
  0x33   :  { %3036 = vmatpush3.bf16.msra.mxu1 %v3605_v32  ;;  %v3530_v36 = vld [vmem:[#allocation5 + $0x168] ss:$12 sps:$4 sm:$0xff]   ;;  %v3890_v39 = vld [vmem:[#allocation2] ss:$12 sps:$4 sm:$0xff]   ;;  %v3610_v42 = vld [vmem:[#allocation5 + $0x38] ss:$12 sps:$4 sm:$0xff]  }
  0x34   :  { %848 = vmatpush1.bf16.msra.mxu0 %v3494_v7  ;;  %3037 = vmatprep.subr.bf16.mxu1 %v3606_v33  ;;  %v3892_v40 = vld [vmem:[#allocation2 + $0x1c] ss:$12 sps:$4 sm:$0xff]   ;;  %v3570_v41 = vld [vmem:[#allocation5 + $0x180] ss:$12 sps:$4 sm:$0xff]   ;;  %v3573_v47 = vld [vmem:[#allocation5 + $0x198] ss:$12 sps:$4 sm:$0xff]  }
  0x35   :  { %849 = vmatprep.subr.bf16.mxu0 %v3495_v8  ;;  %v3611_v43 = vld [vmem:[#allocation5 + $0x110] ss:$12 sps:$4 sm:$0xff]   ;;  %v3613_v46 = vld [vmem:[#allocation5 + $0x128] ss:$12 sps:$4 sm:$0xff]   ;;  %v3536_v49 = vld [vmem:[#allocation2 + $0x18] ss:$12 sps:$4 sm:$0xff]  }
  0x36   :  { %v3575_v44 = vld [vmem:[#allocation5 + $0x19c] ss:$12 sps:$4 sm:$0xff]   ;;  %v3581_v48 = vld [vmem:[#allocation5 + $0x1b4] ss:$12 sps:$4 sm:$0xff]   ;;  %v3584_v54 = vld [vmem:[#allocation5 + $0x1cc] ss:$12 sps:$4 sm:$0xff]  }
  0x37   :  { %3038 = vmatpush3.bf16.msra.mxu1 %v3607_v35  ;;  %v3612_v45 = vld [vmem:[#allocation5 + $0x50] ss:$12 sps:$4 sm:$0xff]   ;;  %v3615_v50 = vld [vmem:[#allocation5 + $0x68] ss:$12 sps:$4 sm:$0xff]   ;;  %v3616_v53 = vld [vmem:[#allocation5 + $0x140] ss:$12 sps:$4 sm:$0xff]  }
  0x38   :  { %850 = vmatpush1.bf16.msra.mxu0 %v3497_v9  ;;  %3039 = vmatprep.subr.bf16.mxu1 %v3608_v38  ;;  %v3537_v51 = vld [vmem:[#allocation2 + $0x34] ss:$12 sps:$4 sm:$0xff]   ;;  %v3579_v52 = vld [vmem:[#allocation5 + $0x1b0] ss:$12 sps:$4 sm:$0xff]   ;;  %v3618_v56 = vld [vmem:[#allocation5 + $0x158] ss:$12 sps:$4 sm:$0xff]  }
  0x39   :  { %851 = vmatprep.subr.bf16.mxu0 %v3498_v10  ;;  %v3617_v55 = vld [vmem:[#allocation5 + $0x80] ss:$12 sps:$4 sm:$0xff]   ;;  %v3582_v57 = vld [vmem:[#allocation5 + $0x1c8] ss:$12 sps:$4 sm:$0xff]   ;;  %v3590_v58 = vld [vmem:[#allocation5 + $0x1e4] ss:$12 sps:$4 sm:$0xff]  }
  0x3a   :  { %v3620_v59 = vld [vmem:[#allocation5 + $0x98] ss:$12 sps:$4 sm:$0xff]   ;;  %v3621_v60 = vld [vmem:[#allocation5 + $0x170] ss:$12 sps:$4 sm:$0xff]   ;;  %v3588_v63 = vld [vmem:[#allocation5 + $0x1e0] ss:$12 sps:$4 sm:$0xff]  }
  0x3b   :  { %3040 = vmatpush3.bf16.msra.mxu1 %v3610_v42  ;;  %v3539_v61 = vld [vmem:[#allocation2 + $0x30] ss:$12 sps:$4 sm:$0xff]   ;;  %v3540_v62 = vld [vmem:[#allocation2 + $0x4c] ss:$12 sps:$4 sm:$0xff]   ;;  %v3599_v3 = vld [vmem:[#allocation5 + $0x214] ss:$12 sps:$4 sm:$0xff]  }
  0x3c   :  { %852 = vmatpush1.bf16.msra.mxu0 %v3500_v11  ;;  %3041 = vmatprep.subr.bf16.mxu1 %v3611_v43  ;;  %v3593_v0 = vld [vmem:[#allocation5 + $0x1fc] ss:$12 sps:$4 sm:$0xff]   ;;  %v3591_v2 = vld [vmem:[#allocation5 + $0x1f8] ss:$12 sps:$4 sm:$0xff]   ;;  %v3636_v10 = vld [vmem:[#allocation5 + $0x1a0] ss:$12 sps:$4 sm:$0xff]  }
  0x3d   :  { %853 = vmatprep.subr.bf16.mxu0 %v3501_v12  ;;  %v3622_v1 = vld [vmem:[#allocation5 + $0xb0] ss:$12 sps:$4 sm:$0xff]   ;;  %v3542_v4 = vld [vmem:[#allocation2 + $0x48] ss:$12 sps:$4 sm:$0xff]   ;;  %v3602_v7 = vld [vmem:[#allocation5 + $0x22c] ss:$12 sps:$4 sm:$0xff]  }
  0x3e   :  { %v3543_v5 = vld [vmem:[#allocation2 + $0x64] ss:$12 sps:$4 sm:$0xff]   ;;  %v3635_v8 = vld [vmem:[#allocation5 + $0x188] ss:$12 sps:$4 sm:$0xff]   ;;  %v3545_v11 = vld [vmem:[#allocation2 + $0x60] ss:$12 sps:$4 sm:$0xff]  }
  0x3f   :  { %3042 = vmatpush3.bf16.msra.mxu1 %v3612_v45  ;;  %v3597_v6 = vld [vmem:[#allocation5 + $0x210] ss:$12 sps:$4 sm:$0xff]   ;;  %v3600_v9 = vld [vmem:[#allocation5 + $0x228] ss:$12 sps:$4 sm:$0xff]   ;;  %v3637_v13 = vld [vmem:[#allocation5 + $0x1b8] ss:$12 sps:$4 sm:$0xff]  }
  0x40   :  { %854 = vmatpush1.bf16.msra.mxu0 %v3503_v14  ;;  %3043 = vmatprep.subr.bf16.mxu1 %v3613_v46  ;;  %v3546_v12 = vld [vmem:[#allocation2 + $0x7c] ss:$12 sps:$4 sm:$0xff]   ;;  %v3564_v30 = vld [vmem:[#allocation2 + $0x10c] ss:$12 sps:$4 sm:$0xff]   ;;  %v3567_v32 = vld [vmem:[#allocation2 + $0x124] ss:$12 sps:$4 sm:$0xff]  }
  0x41   :  { %855 = vmatprep.subr.bf16.mxu0 %v3504_v15  ;;  %v3638_v14 = vld [vmem:[#allocation5 + $0x1d0] ss:$12 sps:$4 sm:$0xff]   ;;  %v3548_v15 = vld [vmem:[#allocation2 + $0x78] ss:$12 sps:$4 sm:$0xff]   ;;  %v3569_v33 = vld [vmem:[#allocation2 + $0x120] ss:$12 sps:$4 sm:$0xff]  }
  0x42   :  { %v3578_v35 = vld [vmem:[#allocation2 + $0x138] ss:$12 sps:$4 sm:$0xff]   ;;  %v3609_v42 = vld [vmem:[#allocation2 + $0x20] ss:$12 sps:$4 sm:$0xff]   ;;  %v3623_v45 = vld [vmem:[#allocation2 + $0x68] ss:$12 sps:$4 sm:$0xff]  }
  0x43   :  { %3044 = vmatpush3.bf16.msra.mxu1 %v3615_v50  ;;  %v3594_v38 = vld [vmem:[#allocation2 + $0x16c] ss:$12 sps:$4 sm:$0xff]   ;;  %vm2040_vm1 = vcmask 261120   ;;  %s3848_s1 = smov [#allocation7]  }
  0x44   :  { %856 = vmatpush1.bf16.msra.mxu0 %v3506_v16  ;;  %3045 = vmatprep.subr.bf16.mxu1 %v3616_v53  ;;  %v3549_v16 = vld [vmem:[#allocation2 + $0x94] ss:$12 sps:$4 sm:$0xff]   ;;  %v3614_v43 = vld [vmem:[#allocation2 + $0x38] ss:$12 sps:$4 sm:$0xff]   ;;  %s2886_s6 = sshll.u32 %s3848_s1, 4  ;;  %s2887_s6 = int_to_ptr.vmem [resolvable:$true] %s2886_s6 }
  0x45   :  { %857 = vmatprep.subr.bf16.mxu0 %v3507_v17  ;;  %v3639_v17 = vld [vmem:[#allocation5 + $0x1e8] ss:$12 sps:$4 sm:$0xff]   ;;  %v3624_v46 = vld [vmem:[#allocation2 + $0x80] ss:$12 sps:$4 sm:$0xff]   ;;  %s3815_s7 = scalar_lea.vmem %s2887_s6, 4096  ;;  %p3820_p3 = scmp.lt.s32.totalorder %s2887_s6, %s2887_s6 }
  0x46   :  { %v3628_v50 = vld [vmem:[#allocation2 + $0xe0] ss:$12 sps:$4 sm:$0xff]   ;;  %v3631_v53 = vld [vmem:[#allocation2 + $0x128] ss:$12 sps:$4 sm:$0xff]   ;;  %p3816_p2 = scmp.ne.s32.totalorder %s2887_s6, %s3815_s7  ;;  %p3821_p4 = scmp.lt.s32.totalorder %s3815_s7, %s3815_s7 }
  0x47   :  { %3046 = vmatpush3.bf16.msra.mxu1 %v3617_v55  ;;  %v3633_v55 = vld [vmem:[#allocation2 + $0x158] ss:$12 sps:$4 sm:$0xff]  }
  0x48   :  { %858 = vmatpush1.bf16.msra.mxu0 %v3509_v18  ;;  %3047 = vmatprep.subr.bf16.mxu1 %v3618_v56  ;;  %v3640_v18 = vld [vmem:[#allocation5 + $0x200] ss:$12 sps:$4 sm:$0xff]   ;;  %v3634_v56 = vld [vmem:[#allocation2 + $0x170] ss:$12 sps:$4 sm:$0xff]   ;;  %p3822_p5 = por %p3821_p4, %p3820_p3 }
  0x49   :  { %859 = vmatprep.subr.bf16.mxu0 %v3510_v19  ;;  %v3551_v19 = vld [vmem:[#allocation2 + $0x90] ss:$12 sps:$4 sm:$0xff]  }
  0x4a   :  { %p3823_p6 = pnand %p3822_p5, %p3816_p2 }
  0x4b   :  { %3048 = vmatpush3.bf16.msra.mxu1 %v3620_v59 }
  0x4c   :  { %860 = vmatpush1.bf16.msra.mxu0 %v3512_v20  ;;  %3049 = vmatprep.subr.bf16.mxu1 %v3621_v60  ;;  %v3552_v20 = vld [vmem:[#allocation2 + $0xac] ss:$12 sps:$4 sm:$0xff]  }
  0x4d   :  { %861 = vmatprep.subr.bf16.mxu0 %v3513_v21  ;;  %v3641_v21 = vld [vmem:[#allocation5 + $0x218] ss:$12 sps:$4 sm:$0xff]  }
  0x4f   :  { %3050 = vmatpush3.bf16.msra.mxu1 %v3622_v1 }
  0x50   :  { %862 = vmatpush1.bf16.msra.mxu0 %v3515_v22  ;;  %3235 = vmatprep.subr.bf16.mxu1 %v3635_v8  ;;  %v3642_v22 = vld [vmem:[#allocation5 + $0x230] ss:$12 sps:$4 sm:$0xff]  }
  0x51   :  { %863 = vmatprep.subr.bf16.mxu0 %v3516_v23  ;;  %v3554_v23 = vld [vmem:[#allocation2 + $0xa8] ss:$12 sps:$4 sm:$0xff]  }
  0x52   :  { %1260 = vmatmul.mubr.bf16.vlgmr.msra.gmra.mrb[0].mxu1 %v3890_v39 }
  0x53   :  { %1267 = vmatprep.mubr.bf16.mxu1 %v3892_v40  ;;  %3236 = vmatpush3.bf16.msra.mxu1 %v3635_v8 }
  0x54   :  { %864 = vmatpush1.bf16.msra.mxu0 %v3518_v24  ;;  %3237 = vmatprep.subr.bf16.mxu1 %v3636_v10  ;;  %v3555_v24 = vld [vmem:[#allocation2 + $0xc4] ss:$12 sps:$4 sm:$0xff]  }
  0x55   :  { %865 = vmatprep.subr.bf16.mxu0 %v3519_v25  ;;  %v3557_v25 = vld [vmem:[#allocation2 + $0xc0] ss:$12 sps:$4 sm:$0xff]  }
  0x57   :  { %3238 = vmatpush3.bf16.msra.mxu1 %v3636_v10 }
  0x58   :  { %866 = vmatpush1.bf16.msra.mxu0 %v3521_v26  ;;  %3239 = vmatprep.subr.bf16.mxu1 %v3637_v13  ;;  %v3558_v26 = vld [vmem:[#allocation2 + $0xdc] ss:$12 sps:$4 sm:$0xff]  }
  0x59   :  { %867 = vmatprep.subr.bf16.mxu0 %v3522_v27  ;;  %v3560_v27 = vld [vmem:[#allocation2 + $0xd8] ss:$12 sps:$4 sm:$0xff]  }
  0x5a   :  { %1268 = vmatmul.mubr.bf16.gmra.mrb[4].mxu1 %v3536_v49 }
  0x5b   :  { %1275 = vmatprep.mubr.bf16.mxu1 %v3537_v51  ;;  %3240 = vmatpush3.bf16.msra.mxu1 %v3637_v13 }
  0x5c   :  { %868 = vmatpush1.bf16.msra.mxu0 %v3524_v28  ;;  %3241 = vmatprep.subr.bf16.mxu1 %v3638_v14  ;;  %v3561_v28 = vld [vmem:[#allocation2 + $0xf4] ss:$12 sps:$4 sm:$0xff]  }
  0x5d   :  { %869 = vmatprep.subr.bf16.mxu0 %v3525_v29  ;;  %v3563_v29 = vld [vmem:[#allocation2 + $0xf0] ss:$12 sps:$4 sm:$0xff]  }
  0x5f   :  { %3242 = vmatpush3.bf16.msra.mxu1 %v3638_v14 }
  0x60   :  { %870 = vmatpush1.bf16.msra.mxu0 %v3527_v31  ;;  %3243 = vmatprep.subr.bf16.mxu1 %v3639_v17  ;;  %v3566_v31 = vld [vmem:[#allocation2 + $0x108] ss:$12 sps:$4 sm:$0xff]  }
  0x61   :  { %871 = vmatprep.subr.bf16.mxu0 %v3528_v34  ;;  %v3576_v34 = vld [vmem:[#allocation2 + $0x13c] ss:$12 sps:$4 sm:$0xff]  }
  0x62   :  { %1276 = vmatmul.mubr.bf16.gmra.mrb[8].mxu1 %v3539_v61 }
  0x63   :  { %1283 = vmatprep.mubr.bf16.mxu1 %v3540_v62  ;;  %3244 = vmatpush3.bf16.msra.mxu1 %v3639_v17 }
  0x64   :  { %872 = vmatpush1.bf16.msra.mxu0 %v3530_v36  ;;  %3245 = vmatprep.subr.bf16.mxu1 %v3640_v18  ;;  %v3585_v36 = vld [vmem:[#allocation2 + $0x154] ss:$12 sps:$4 sm:$0xff]  }
  0x65   :  { %1034 = vmatprep.subr.bf16.mxu0 %v3572_v37  ;;  %v3587_v37 = vld [vmem:[#allocation2 + $0x150] ss:$12 sps:$4 sm:$0xff]  }
  0x67   :  { %874 = vmatmul.mubr.bf16.vlgmr.msra.gmra.mrb[0].mxu0 %v3890_v39  ;;  %3246 = vmatpush3.bf16.msra.mxu1 %v3640_v18  ;;  %v3596_v39 = vld [vmem:[#allocation2 + $0x168] ss:$12 sps:$4 sm:$0xff]  }
  0x68   :  { %883 = vmatprep.mubr.bf16.mxu0 %v3892_v40  ;;  %1035 = vmatpush1.bf16.msra.mxu0 %v3570_v41  ;;  %v3847_v40 = vmov 0   ;;  %v3604_v41 = vld [vmem:[#allocation2 + $0x8] ss:$12 sps:$4 sm:$0xff]  }
  0x69   :  { %1036 = vmatprep.subr.bf16.mxu0 %v3575_v44  ;;  %3247 = vmatprep.subr.bf16.mxu1 %v3641_v21  ;;  %v3619_v44 = vld [vmem:[#allocation2 + $0x50] ss:$12 sps:$4 sm:$0xff]  }
  0x6a   :  { %1284 = vmatmul.mubr.bf16.gmra.mrb[12].mxu1 %v3542_v4 }
  0x6b   :  { %1291 = vmatprep.mubr.bf16.mxu1 %v3543_v5  ;;  %3248 = vmatpush3.bf16.msra.mxu1 %v3641_v21 }
  0x6c   :  { %1037 = vmatpush1.bf16.msra.mxu0 %v3573_v47  ;;  %3249 = vmatprep.subr.bf16.mxu1 %v3642_v22  ;;  %v3625_v47 = vld [vmem:[#allocation2 + $0x98] ss:$12 sps:$4 sm:$0xff]  }
  0x6d   :  { %1038 = vmatprep.subr.bf16.mxu0 %v3581_v48  ;;  %v3626_v48 = vld [vmem:[#allocation2 + $0xb0] ss:$12 sps:$4 sm:$0xff]  }
  0x6f   :  { %884 = vmatmul.mubr.bf16.gmra.mrb[4].mxu0 %v3536_v49  ;;  %3250 = vmatpush3.bf16.msra.mxu1 %v3642_v22  ;;  %v3627_v49 = vld [vmem:[#allocation2 + $0xc8] ss:$12 sps:$4 sm:$0xff]  }
  0x70   :  { %893 = vmatprep.mubr.bf16.mxu0 %v3537_v51  ;;  %1039 = vmatpush1.bf16.msra.mxu0 %v3579_v52  ;;  %v3629_v51 = vld [vmem:[#allocation2 + $0xf8] ss:$12 sps:$4 sm:$0xff]   ;;  %v3630_v52 = vld [vmem:[#allocation2 + $0x110] ss:$12 sps:$4 sm:$0xff]  }
  0x71   :  { %1040 = vmatprep.subr.bf16.mxu0 %v3584_v54  ;;  %v3632_v54 = vld [vmem:[#allocation2 + $0x140] ss:$12 sps:$4 sm:$0xff]  }
  0x72   :  { %1292 = vmatmul.mubr.bf16.gmra.mrb[16].mxu1 %v3545_v11 }
  0x73   :  { %1299 = vmatprep.mubr.bf16.mxu1 %v3546_v12 }
  0x74   :  { %1041 = vmatpush1.bf16.msra.mxu0 %v3582_v57 }
  0x75   :  { %1042 = vmatprep.subr.bf16.mxu0 %v3590_v58 }
  0x77   :  { %894 = vmatmul.mubr.bf16.gmra.mrb[8].mxu0 %v3539_v61 }
  0x78   :  { %903 = vmatprep.mubr.bf16.mxu0 %v3540_v62  ;;  %1043 = vmatpush1.bf16.msra.mxu0 %v3588_v63 }
  0x79   :  { %1044 = vmatprep.subr.bf16.mxu0 %v3593_v0 }
  0x7a   :  { %1300 = vmatmul.mubr.bf16.gmra.mrb[20].mxu1 %v3548_v15 }
  0x7b   :  { %1307 = vmatprep.mubr.bf16.mxu1 %v3549_v16 }
  0x7c   :  { %1045 = vmatpush1.bf16.msra.mxu0 %v3591_v2 }
  0x7d   :  { %1046 = vmatprep.subr.bf16.mxu0 %v3599_v3 }
  0x7f   :  { %904 = vmatmul.mubr.bf16.gmra.mrb[12].mxu0 %v3542_v4 }
  0x80   :  { %913 = vmatprep.mubr.bf16.mxu0 %v3543_v5  ;;  %1047 = vmatpush1.bf16.msra.mxu0 %v3597_v6 }
  0x81   :  { %1048 = vmatprep.subr.bf16.mxu0 %v3602_v7 }
  0x82   :  { %1308 = vmatmul.mubr.bf16.gmra.mrb[24].mxu1 %v3551_v19 }
  0x83   :  { %1315 = vmatprep.mubr.bf16.mxu1 %v3552_v20 }
  0x84   :  { %1049 = vmatpush1.bf16.msra.mxu0 %v3600_v9 }
  0x87   :  { %914 = vmatmul.mubr.bf16.gmra.mrb[16].mxu0 %v3545_v11 }
  0x88   :  { %923 = vmatprep.mubr.bf16.mxu0 %v3546_v12 }
  0x8a   :  { %1316 = vmatmul.mubr.bf16.gmra.mrb[28].mxu1 %v3554_v23 }
  0x8b   :  { %1323 = vmatprep.mubr.bf16.mxu1 %v3555_v24 }
  0x8f   :  { %924 = vmatmul.mubr.bf16.gmra.mrb[20].mxu0 %v3548_v15 }
  0x90   :  { %933 = vmatprep.mubr.bf16.mxu0 %v3549_v16 }
  0x92   :  { %1324 = vmatmul.mubr.bf16.gmra.mrb[32].mxu1 %v3557_v25 }
  0x93   :  { %1331 = vmatprep.mubr.bf16.mxu1 %v3558_v26 }
  0x97   :  { %934 = vmatmul.mubr.bf16.gmra.mrb[24].mxu0 %v3551_v19 }
  0x98   :  { %943 = vmatprep.mubr.bf16.mxu0 %v3552_v20 }
  0x9a   :  { %1332 = vmatmul.mubr.bf16.gmra.mrb[36].mxu1 %v3560_v27 }
  0x9b   :  { %1339 = vmatprep.mubr.bf16.mxu1 %v3561_v28 }
  0x9f   :  { %944 = vmatmul.mubr.bf16.gmra.mrb[28].mxu0 %v3554_v23 }
  0xa0   :  { %953 = vmatprep.mubr.bf16.mxu0 %v3555_v24 }
  0xa2   :  { %1340 = vmatmul.mubr.bf16.gmra.mrb[40].mxu1 %v3563_v29 }
  0xa3   :  { %1347 = vmatprep.mubr.bf16.mxu1 %v3564_v30 }
  0xa7   :  { %954 = vmatmul.mubr.bf16.gmra.mrb[32].mxu0 %v3557_v25 }
  0xa8   :  { %963 = vmatprep.mubr.bf16.mxu0 %v3558_v26 }
  0xaa   :  { %1348 = vmatmul.mubr.bf16.gmra.mrb[44].mxu1 %v3566_v31 }
  0xab   :  { %1355 = vmatprep.mubr.bf16.mxu1 %v3567_v32 }
  0xaf   :  { %964 = vmatmul.mubr.bf16.gmra.mrb[36].mxu0 %v3560_v27 }
  0xb0   :  { %973 = vmatprep.mubr.bf16.mxu0 %v3561_v28 }
  0xb2   :  { %1356 = vmatmul.mubr.bf16.gmra.mrb[48].mxu1 %v3569_v33 }
  0xb3   :  { %1363 = vmatprep.mubr.bf16.mxu1 %v3576_v34 }
  0xb7   :  { %974 = vmatmul.mubr.bf16.gmra.mrb[40].mxu0 %v3563_v29 }
  0xb8   :  { %983 = vmatprep.mubr.bf16.mxu0 %v3564_v30 }
  0xba   :  { %1364 = vmatmul.mubr.bf16.gmra.mrb[52].mxu1 %v3578_v35 }
  0xbb   :  { %1371 = vmatprep.mubr.bf16.mxu1 %v3585_v36 }
  0xbf   :  { %984 = vmatmul.mubr.bf16.gmra.mrb[44].mxu0 %v3566_v31 }
  0xc0   :  { %993 = vmatprep.mubr.bf16.mxu0 %v3567_v32 }
  0xc2   :  { %1372 = vmatmul.mubr.bf16.gmra.mrb[56].mxu1 %v3587_v37 }
  0xc3   :  { %1379 = vmatprep.mubr.bf16.mxu1 %v3594_v38 }
  0xc7   :  { %994 = vmatmul.mubr.bf16.gmra.mrb[48].mxu0 %v3569_v33 }
  0xc8   :  { %1003 = vmatprep.mubr.bf16.mxu0 %v3576_v34 }
  0xca   :  { %1380 = vmatmul.mubr.bf16.gmra.mrb[60].mxu1 %v3596_v39 }
  0xcb   :  { %3251 = vmatprep.mubr.bf16.mxu1 %v3604_v41 }
  0xcf   :  { %1004 = vmatmul.mubr.bf16.gmra.mrb[52].mxu0 %v3578_v35 }
  0xd0   :  { %1013 = vmatprep.mubr.bf16.mxu0 %v3585_v36 }
  0xd2   :  { %3252 = vmatmul.mubr.bf16.vlgmr.msra.gmra.mrb[64].mxu1 %v3609_v42 }
  0xd3   :  { %3255 = vmatprep.mubr.bf16.mxu1 %v3614_v43 }
  0xd7   :  { %1014 = vmatmul.mubr.bf16.gmra.mrb[56].mxu0 %v3587_v37 }
  0xd8   :  { %1023 = vmatprep.mubr.bf16.mxu0 %v3594_v38 }
  0xda   :  { %3256 = vmatmul.mubr.bf16.gmra.mrb[68].mxu1 %v3619_v44 }
  0xdb   :  { %3259 = vmatprep.mubr.bf16.mxu1 %v3623_v45 }
  0xdf   :  { %1024 = vmatmul.mubr.bf16.gmra.mrb[60].mxu0 %v3596_v39 }
  0xe0   :  { %1066 = vmatprep.mubr.bf16.mxu0 %v3847_v40 }
  0xe2   :  { %3260 = vmatmul.mubr.bf16.gmra.mrb[72].mxu1 %v3624_v46 }
  0xe3   :  { %3263 = vmatprep.mubr.bf16.mxu1 %v3625_v47 }
  0xe7   :  { %1067 = vmatmul.mubr.bf16.vlgmr.msra.gmra.mrb[0].mxu0 %v3604_v41 }
  0xe8   :  { %1076 = vmatprep.mubr.bf16.mxu0 %v3847_v40 }
  0xea   :  { %3264 = vmatmul.mubr.bf16.gmra.mrb[76].mxu1 %v3626_v48 }
  0xeb   :  { %3267 = vmatprep.mubr.bf16.mxu1 %v3627_v49 }
  0xef   :  { %1077 = vmatmul.mubr.bf16.gmra.mrb[4].mxu0 %v3609_v42 }
  0xf0   :  { %1086 = vmatprep.mubr.bf16.mxu0 %v3847_v40 }
  0xf2   :  { %3268 = vmatmul.mubr.bf16.gmra.mrb[80].mxu1 %v3628_v50 }
  0xf3   :  { %3271 = vmatprep.mubr.bf16.mxu1 %v3629_v51 }
  0xf7   :  { %1087 = vmatmul.mubr.bf16.gmra.mrb[8].mxu0 %v3614_v43 }
  0xf8   :  { %1096 = vmatprep.mubr.bf16.mxu0 %v3847_v40 }
  0xfa   :  { %3272 = vmatmul.mubr.bf16.gmra.mrb[84].mxu1 %v3630_v52 }
  0xfb   :  { %3275 = vmatprep.mubr.bf16.mxu1 %v3631_v53 }
  0xff   :  { %1097 = vmatmul.mubr.bf16.gmra.mrb[12].mxu0 %v3619_v44 }
 0x100   :  { %1106 = vmatprep.mubr.bf16.mxu0 %v3847_v40 }
 0x102   :  { %3276 = vmatmul.mubr.bf16.gmra.mrb[88].mxu1 %v3632_v54 }
 0x103   :  { %3279 = vmatprep.mubr.bf16.mxu1 %v3633_v55 }
 0x107   :  { %1107 = vmatmul.mubr.bf16.gmra.mrb[16].mxu0 %v3623_v45 }
 0x108   :  { %1116 = vmatprep.mubr.bf16.mxu0 %v3847_v40 }
 0x10a   :  { %3280 = vmatmul.mubr.bf16.gmra.mrb[92].mxu1 %v3634_v56 }
 0x10f   :  { %1117 = vmatmul.mubr.bf16.gmra.mrb[20].mxu0 %v3624_v46 }
 0x110   :  { %1126 = vmatprep.mubr.bf16.mxu0 %v3847_v40 }
 0x117   :  { %1127 = vmatmul.mubr.bf16.gmra.mrb[24].mxu0 %v3625_v47 }
 0x118   :  { %1136 = vmatprep.mubr.bf16.mxu0 %v3847_v40 }
 0x11f   :  { %1137 = vmatmul.mubr.bf16.gmra.mrb[28].mxu0 %v3626_v48 }
 0x120   :  { %1146 = vmatprep.mubr.bf16.mxu0 %v3847_v40 }
 0x125   :  { %v3051_v57 = vpop.f32.mrb[0].mxu1 }
 0x126   :  { %v3052_v58 = vpop.f32.mrb[1].mxu1 }
 0x127   :  { %1147 = vmatmul.mubr.bf16.gmra.mrb[32].mxu0 %v3627_v49  ;;  %v3054_v59 = vpop.f32.mrb[2].mxu1  ;;  %v3914_v13 = vadd.f32 %v3052_v58, %v3051_v57 }
 0x128   :  { %1156 = vmatprep.mubr.bf16.mxu0 %v3847_v40  ;;  %v3055_v60 = vpop.f32.mrb[3].mxu1 }
 0x129   :  { %v3916_v14 = vadd.f32 %v3055_v60, %v3054_v59 }
 0x12d   :  { %v3057_v61 = vpop.f32.mrb[4].mxu1 }
 0x12e   :  { %v3058_v62 = vpop.f32.mrb[5].mxu1 }
 0x12f   :  { %1157 = vmatmul.mubr.bf16.gmra.mrb[36].mxu0 %v3628_v50  ;;  %v3060_v63 = vpop.f32.mrb[6].mxu1  ;;  %v3918_v19 = vadd.f32 %v3058_v62, %v3057_v61 }
 0x130   :  { %1166 = vmatprep.mubr.bf16.mxu0 %v3847_v40  ;;  %v3061_v0 = vpop.f32.mrb[7].mxu1 }
 0x131   :  { %v3920_v20 = vadd.f32 %v3061_v0, %v3060_v63 }
 0x135   :  { %v3063_v1 = vpop.f32.mrb[8].mxu1 }
 0x136   :  { %v3064_v2 = vpop.f32.mrb[9].mxu1 }
 0x137   :  { %1167 = vmatmul.mubr.bf16.gmra.mrb[40].mxu0 %v3629_v51  ;;  %v3066_v3 = vpop.f32.mrb[10].mxu1  ;;  %v3922_v25 = vadd.f32 %v3064_v2, %v3063_v1 }
 0x138   :  { %1176 = vmatprep.mubr.bf16.mxu0 %v3847_v40  ;;  %v3067_v4 = vpop.f32.mrb[11].mxu1 }
 0x139   :  { %v3924_v26 = vadd.f32 %v3067_v4, %v3066_v3 }
 0x13d   :  { %v3069_v5 = vpop.f32.mrb[12].mxu1 }
 0x13e   :  { %v3070_v6 = vpop.f32.mrb[13].mxu1 }
 0x13f   :  { %1177 = vmatmul.mubr.bf16.gmra.mrb[44].mxu0 %v3630_v52  ;;  %v3072_v7 = vpop.f32.mrb[14].mxu1  ;;  %v3926_v31 = vadd.f32 %v3070_v6, %v3069_v5 }
 0x140   :  { %1186 = vmatprep.mubr.bf16.mxu0 %v3847_v40  ;;  %v3073_v8 = vpop.f32.mrb[15].mxu1 }
 0x141   :  { %v3928_v32 = vadd.f32 %v3073_v8, %v3072_v7 }
 0x145   :  { %v3075_v9 = vpop.f32.mrb[16].mxu1 }
 0x146   :  { %v3076_v10 = vpop.f32.mrb[17].mxu1 }
 0x147   :  { %1187 = vmatmul.mubr.bf16.gmra.mrb[48].mxu0 %v3631_v53  ;;  %v3078_v11 = vpop.f32.mrb[18].mxu1  ;;  %v3930_v37 = vadd.f32 %v3076_v10, %v3075_v9 }
 0x148   :  { %1196 = vmatprep.mubr.bf16.mxu0 %v3847_v40  ;;  %v3079_v12 = vpop.f32.mrb[19].mxu1 }
 0x149   :  { %v3932_v38 = vadd.f32 %v3079_v12, %v3078_v11 }
 0x14d   :  { %v3081_v15 = vpop.f32.mrb[20].mxu1 }
 0x14e   :  { %v3082_v16 = vpop.f32.mrb[21].mxu1 }
 0x14f   :  { %1197 = vmatmul.mubr.bf16.gmra.mrb[52].mxu0 %v3632_v54  ;;  %v3084_v17 = vpop.f32.mrb[22].mxu1  ;;  %v3934_v43 = vadd.f32 %v3082_v16, %v3081_v15 }
 0x150   :  { %1206 = vmatprep.mubr.bf16.mxu0 %v3847_v40  ;;  %v3085_v18 = vpop.f32.mrb[23].mxu1 }
 0x151   :  { %v3936_v44 = vadd.f32 %v3085_v18, %v3084_v17 }
 0x155   :  { %v3087_v21 = vpop.f32.mrb[24].mxu1 }
 0x156   :  { %v3088_v22 = vpop.f32.mrb[25].mxu1 }
 0x157   :  { %1207 = vmatmul.mubr.bf16.gmra.mrb[56].mxu0 %v3633_v55  ;;  %v3090_v23 = vpop.f32.mrb[26].mxu1  ;;  %v3938_v49 = vadd.f32 %v3088_v22, %v3087_v21 }
 0x158   :  { %1216 = vmatprep.mubr.bf16.mxu0 %v3847_v40  ;;  %v3091_v24 = vpop.f32.mrb[27].mxu1 }
 0x159   :  { %v3940_v50 = vadd.f32 %v3091_v24, %v3090_v23 }
 0x15d   :  { %v3093_v27 = vpop.f32.mrb[28].mxu1 }
 0x15e   :  { %v3094_v28 = vpop.f32.mrb[29].mxu1 }
 0x15f   :  { %1217 = vmatmul.mubr.bf16.gmra.mrb[60].mxu0 %v3634_v56  ;;  %v3096_v29 = vpop.f32.mrb[30].mxu1  ;;  %v3942_v55 = vadd.f32 %v3094_v28, %v3093_v27 }
 0x160   :  { %v3097_v30 = vpop.f32.mrb[31].mxu1 }
 0x161   :  { %v3944_v56 = vadd.f32 %v3097_v30, %v3096_v29 }
 0x165   :  { %v3099_v33 = vpop.f32.mrb[32].mxu1 }
 0x166   :  { %v3100_v34 = vpop.f32.mrb[33].mxu1 }
 0x167   :  { %v3102_v35 = vpop.f32.mrb[34].mxu1  ;;  %v3946_v61 = vadd.f32 %v3100_v34, %v3099_v33 }
 0x168   :  { %v3103_v36 = vpop.f32.mrb[35].mxu1 }
 0x169   :  { %v3948_v62 = vadd.f32 %v3103_v36, %v3102_v35 }
 0x16d   :  { %v3105_v39 = vpop.f32.mrb[36].mxu1 }
 0x16e   :  { %v3106_v40 = vpop.f32.mrb[37].mxu1 }
 0x16f   :  { %v3108_v41 = vpop.f32.mrb[38].mxu1  ;;  %v3950_v1 = vadd.f32 %v3106_v40, %v3105_v39 }
 0x170   :  { %v3109_v42 = vpop.f32.mrb[39].mxu1 }
 0x171   :  { %v3952_v9 = vadd.f32 %v3109_v42, %v3108_v41 }
 0x175   :  { %v3111_v45 = vpop.f32.mrb[40].mxu1 }
 0x176   :  { %v3112_v46 = vpop.f32.mrb[41].mxu1 }
 0x177   :  { %v3114_v47 = vpop.f32.mrb[42].mxu1  ;;  %v3954_v12 = vadd.f32 %v3112_v46, %v3111_v45 }
 0x178   :  { %v3115_v48 = vpop.f32.mrb[43].mxu1 }
 0x179   :  { %v3956_v15 = vadd.f32 %v3115_v48, %v3114_v47 }
 0x17d   :  { %v3117_v51 = vpop.f32.mrb[44].mxu1 }
 0x17e   :  { %v3118_v52 = vpop.f32.mrb[45].mxu1 }
 0x17f   :  { %v3120_v53 = vpop.f32.mrb[46].mxu1  ;;  %v3958_v16 = vadd.f32 %v3118_v52, %v3117_v51 }
 0x180   :  { %v3121_v54 = vpop.f32.mrb[47].mxu1 }
 0x181   :  { %v3960_v17 = vadd.f32 %v3121_v54, %v3120_v53 }
 0x185   :  { %v3123_v57 = vpop.f32.mrb[48].mxu1 }
 0x186   :  { %v3124_v58 = vpop.f32.mrb[49].mxu1 }
 0x187   :  { %v3126_v59 = vpop.f32.mrb[50].mxu1  ;;  %v3962_v21 = vadd.f32 %v3124_v58, %v3123_v57 }
 0x188   :  { %v3127_v60 = vpop.f32.mrb[51].mxu1 }
 0x189   :  { %v3964_v22 = vadd.f32 %v3127_v60, %v3126_v59 }
 0x18d   :  { %v3129_v63 = vpop.f32.mrb[52].mxu1 }
 0x18e   :  { %v3130_v0 = vpop.f32.mrb[53].mxu1 }
 0x18f   :  { %v3132_v2 = vpop.f32.mrb[54].mxu1  ;;  %v3966_v23 = vadd.f32 %v3130_v0, %v3129_v63 }
 0x190   :  { %v3133_v4 = vpop.f32.mrb[55].mxu1 }
 0x191   :  { %v3968_v24 = vadd.f32 %v3133_v4, %v3132_v2 }
 0x195   :  { %v3135_v11 = vpop.f32.mrb[56].mxu1 }
 0x196   :  { %v3136_v18 = vpop.f32.mrb[57].mxu1 }
 0x197   :  { %v3138_v27 = vpop.f32.mrb[58].mxu1  ;;  %v3970_v29 = vadd.f32 %v3136_v18, %v3135_v11 }
 0x198   :  { %v3139_v30 = vpop.f32.mrb[59].mxu1 }
 0x199   :  { %v3972_v34 = vadd.f32 %v3139_v30, %v3138_v27 }
 0x19d   :  { %v3141_v41 = vpop.f32.mrb[60].mxu1 }
 0x19e   :  { %v3142_v42 = vpop.f32.mrb[61].mxu1 }
 0x19f   :  { %v3974_v45 = vadd.f32 %v3142_v42, %v3141_v41  ;;  %v3144_v46 = vpop.f32.mrb[62].mxu1 }
 0x1a0   :  { %v3145_v48 = vpop.f32.mrb[63].mxu1 }
 0x1a1   :  { %v3976_v52 = vadd.f32 %v3145_v48, %v3144_v46 }
 0x1a5   :  { %v3253_v59 = vpop.f32.mrb[64].mxu1 }
 0x1a6   :  { %v1431_v60 = vadd.f32 %v3253_v59, %v3918_v19  ;;  %v1422_v63 = vpop.f32.mrb[65].mxu1 }
 0x1a7   :  { %v1423_v0 = vadd.f32 %v3914_v13, %v1422_v63  ;;  %v3254_v2 = vpop.f32.mrb[66].mxu1 }
 0x1a8   :  { %v1434_v4 = vadd.f32 %v3254_v2, %v3920_v20 }
 0x1ba   :  { %v1068_v3 = vpop.f32.mrb[0].mxu0 }
 0x1bb   :  { %v1070_v5 = vpop.f32.mrb[1].mxu0 }
 0x1bc   :  { %v1072_v6 = vpop.f32.mrb[2].mxu0 }
 0x1bd   :  { %v1549_v7 = vpack.c.bf16 %v1072_v6, %v1068_v3  ;;  %v1074_v8 = vpop.f32.mrb[3].mxu0 }
 0x1be   :  { %v1565_v10 = vpack.c.bf16 %v1074_v8, %v1070_v5  ;;  %v1425_v5 = vpop.f32.mrb[67].mxu1 }
 0x1bf   :  { %3287 = vmatprep.mubr.bf16.mxu1 %v1549_v7  ;;  %v1426_v7 = vadd.f32 %v3916_v14, %v1425_v5 }
 0x1c0   :  { %3283 = vmatprep.subr.bf16.mxu1 %v1565_v10 }
 0x1c1   :  { %3284 = vmatpush3.bf16.xpose.msra.mxu1 %v1565_v10  ;;  %v3982_v10 = vpack.c.bf16 %v1434_v4, %v1431_v60  ;;  %v3984_v27 = vpack.c.bf16 %v1426_v7, %v1423_v0 }
 0x1c2   :  { %v1078_v28 = vpop.f32.mrb[4].mxu0 }
 0x1c3   :  { %v1080_v33 = vpop.f32.mrb[5].mxu0 }
 0x1c4   :  { %v1082_v35 = vpop.f32.mrb[6].mxu0 }
 0x1c5   :  { %v1550_v36 = vpack.c.bf16 %v1082_v35, %v1078_v28  ;;  %v1084_v39 = vpop.f32.mrb[7].mxu0  ;;  %v3257_v28 = vpop.f32.mrb[68].mxu1 }
 0x1c6   :  { %v1566_v40 = vpack.c.bf16 %v1084_v39, %v1080_v33  ;;  %v1447_v13 = vadd.f32 %v3257_v28, %v3926_v31  ;;  %v1438_v30 = vpop.f32.mrb[69].mxu1 }
 0x1c7   :  { %v1439_v20 = vadd.f32 %v3922_v25, %v1438_v30  ;;  %v3258_v33 = vpop.f32.mrb[70].mxu1 }
 0x1c8   :  { %3285 = vmatprep.subr.bf16.mxu1 %v1566_v40  ;;  %v1450_v14 = vadd.f32 %v3258_v33, %v3928_v32 }
 0x1c9   :  { %3286 = vmatpush3.bf16.xpose.msra.mxu1 %v1566_v40 }
 0x1ca   :  { %v1088_v47 = vpop.f32.mrb[8].mxu0  ;;  %v3990_v42 = vpack.c.bf16 %v1450_v14, %v1447_v13 }
 0x1cb   :  { %v1090_v51 = vpop.f32.mrb[9].mxu0 }
 0x1cc   :  { %v1092_v53 = vpop.f32.mrb[10].mxu0 }
 0x1cd   :  { %v1551_v54 = vpack.c.bf16 %v1092_v53, %v1088_v47  ;;  %v1094_v57 = vpop.f32.mrb[11].mxu0 }
 0x1ce   :  { %v1567_v58 = vpack.c.bf16 %v1094_v57, %v1090_v51 }
 0x1d0   :  { %3288 = vmatmul.mubr.bf16.vlgmr.msra.gmra.mrb[96].mxu1 %v1550_v36  ;;  %3291 = vmatprep.subr.bf16.mxu1 %v1567_v58  ;;  %v1441_v36 = vpop.f32.mrb[71].mxu1 }
 0x1d1   :  { %3292 = vmatpush3.bf16.xpose.msra.mxu1 %v1567_v58  ;;  %3295 = vmatprep.mubr.bf16.mxu1 %v1551_v54  ;;  %v1442_v40 = vadd.f32 %v3924_v26, %v1441_v36  ;;  %v3261_v51 = vpop.f32.mrb[72].mxu1 }
 0x1d2   :  { %v1098_v3 = vpop.f32.mrb[12].mxu0  ;;  %v1463_v25 = vadd.f32 %v3261_v51, %v3934_v43  ;;  %v1454_v53 = vpop.f32.mrb[73].mxu1 }
 0x1d3   :  { %v1100_v6 = vpop.f32.mrb[13].mxu0  ;;  %v3992_v48 = vpack.c.bf16 %v1442_v40, %v1439_v20  ;;  %v1455_v32 = vadd.f32 %v3930_v37, %v1454_v53  ;;  %v3262_v54 = vpop.f32.mrb[74].mxu1 }
 0x1d4   :  { %v1102_v8 = vpop.f32.mrb[14].mxu0  ;;  %v1466_v57 = vadd.f32 %v3262_v54, %v3936_v44  ;;  %v1457_v58 = vpop.f32.mrb[75].mxu1 }
 0x1d5   :  { %v1552_v11 = vpack.c.bf16 %v1102_v8, %v1098_v3  ;;  %v1104_v18 = vpop.f32.mrb[15].mxu0  ;;  %v1458_v60 = vadd.f32 %v3932_v38, %v1457_v58  ;;  %v3265_v5 = vpop.f32.mrb[76].mxu1 }
 0x1d6   :  { %v1568_v19 = vpack.c.bf16 %v1104_v18, %v1100_v6  ;;  %v3998_v0 = vpack.c.bf16 %v1466_v57, %v1463_v25  ;;  %v1479_v37 = vadd.f32 %v3265_v5, %v3942_v55  ;;  %v1470_v6 = vpop.f32.mrb[77].mxu1 }
 0x1d7   :  { %v4000_v4 = vpack.c.bf16 %v1458_v60, %v1455_v32  ;;  %v1471_v44 = vadd.f32 %v3938_v49, %v1470_v6  ;;  %v3266_v7 = vpop.f32.mrb[78].mxu1 }
 0x1d8   :  { %3293 = vmatprep.subr.bf16.mxu1 %v1568_v19  ;;  %v1482_v38 = vadd.f32 %v3266_v7, %v3944_v56 }
 0x1d9   :  { %3294 = vmatpush3.bf16.xpose.msra.mxu1 %v1568_v19 }
 0x1da   :  { %v1108_v35 = vpop.f32.mrb[16].mxu0  ;;  %v4006_v13 = vpack.c.bf16 %v1482_v38, %v1479_v37 }
 0x1db   :  { %v1110_v39 = vpop.f32.mrb[17].mxu0 }
 0x1dc   :  { %v1112_v41 = vpop.f32.mrb[18].mxu0 }
 0x1dd   :  { %v1553_v46 = vpack.c.bf16 %v1112_v41, %v1108_v35  ;;  %v1114_v47 = vpop.f32.mrb[19].mxu0 }
 0x1de   :  { %v1569_v31 = vpack.c.bf16 %v1114_v47, %v1110_v39 }
 0x1e0   :  { %3296 = vmatmul.mubr.bf16.vlgmr.msra.gmra.mrb[100].mxu1 %v1552_v11  ;;  %3299 = vmatprep.subr.bf16.mxu1 %v1569_v31  ;;  %v1473_v11 = vpop.f32.mrb[79].mxu1 }
 0x1e1   :  { %3300 = vmatpush3.bf16.xpose.msra.mxu1 %v1569_v31  ;;  %3303 = vmatprep.mubr.bf16.mxu1 %v1553_v46  ;;  %v1474_v19 = vadd.f32 %v3940_v50, %v1473_v11  ;;  %v3269_v35 = vpop.f32.mrb[80].mxu1 }
 0x1e2   :  { %v1118_v26 = vpop.f32.mrb[20].mxu0  ;;  %v1495_v49 = vadd.f32 %v3269_v35, %v3950_v1  ;;  %v1486_v14 = vpop.f32.mrb[81].mxu1 }
 0x1e3   :  { %v1120_v59 = vpop.f32.mrb[21].mxu0  ;;  %v4008_v33 = vpack.c.bf16 %v1474_v19, %v1471_v44  ;;  %v1487_v56 = vadd.f32 %v3946_v61, %v1486_v14  ;;  %v3270_v36 = vpop.f32.mrb[82].mxu1 }
 0x1e4   :  { %v1122_v63 = vpop.f32.mrb[22].mxu0  ;;  %v1498_v39 = vadd.f32 %v3270_v36, %v3952_v9  ;;  %v1489_v40 = vpop.f32.mrb[83].mxu1 }
 0x1e5   :  { %v1554_v2 = vpack.c.bf16 %v1122_v63, %v1118_v26  ;;  %v1124_v3 = vpop.f32.mrb[23].mxu0  ;;  %v1490_v46 = vadd.f32 %v3948_v62, %v1489_v40  ;;  %v3273_v32 = vpop.f32.mrb[84].mxu1 }
 0x1e6   :  { %v1570_v43 = vpack.c.bf16 %v1124_v3, %v1120_v59  ;;  %v4014_v31 = vpack.c.bf16 %v1498_v39, %v1495_v49  ;;  %v1511_v61 = vadd.f32 %v3273_v32, %v3958_v16  ;;  %v1502_v54 = vpop.f32.mrb[85].mxu1 }
 0x1e7   :  { %v4016_v53 = vpack.c.bf16 %v1490_v46, %v1487_v56  ;;  %v1503_v9 = vadd.f32 %v3954_v12, %v1502_v54  ;;  %v3274_v26 = vpop.f32.mrb[86].mxu1 }
 0x1e8   :  { %3301 = vmatprep.subr.bf16.mxu1 %v1570_v43  ;;  %v1514_v62 = vadd.f32 %v3274_v26, %v3960_v17  ;;  %v1505_v58 = vpop.f32.mrb[87].mxu1 }
 0x1e9   :  { %3302 = vmatpush3.bf16.xpose.msra.mxu1 %v1570_v43  ;;  %v1506_v60 = vadd.f32 %v3956_v15, %v1505_v58  ;;  %v3277_v37 = vpop.f32.mrb[88].mxu1 }
 0x1ea   :  { %v1128_v8 = vpop.f32.mrb[24].mxu0  ;;  %v1527_v12 = vadd.f32 %v3277_v37, %v3966_v23  ;;  %v1518_v6 = vpop.f32.mrb[89].mxu1 }
 0x1eb   :  { %v1130_v18 = vpop.f32.mrb[25].mxu0  ;;  %v4024_v5 = vpack.c.bf16 %v1506_v60, %v1503_v9  ;;  %v1519_v17 = vadd.f32 %v3962_v21, %v1518_v6  ;;  %v3278_v44 = vpop.f32.mrb[90].mxu1 }
 0x1ec   :  { %v1132_v28 = vpop.f32.mrb[26].mxu0  ;;  %v1530_v7 = vadd.f32 %v3278_v44, %v3968_v24 }
 0x1ed   :  { %v1555_v30 = vpack.c.bf16 %v1132_v28, %v1128_v8  ;;  %v1134_v20 = vpop.f32.mrb[27].mxu0  ;;  %v1521_v8 = vpop.f32.mrb[91].mxu1 }
 0x1ee   :  { %v1571_v55 = vpack.c.bf16 %v1134_v20, %v1130_v18  ;;  %v1522_v11 = vadd.f32 %v3964_v22, %v1521_v8  ;;  %v4030_v19 = vpack.c.bf16 %v1530_v7, %v1527_v12 }
 0x1f0   :  { %3304 = vmatmul.mubr.bf16.vlgmr.msra.gmra.mrb[104].mxu1 %v1554_v2  ;;  %3307 = vmatprep.subr.bf16.mxu1 %v1571_v55  ;;  %v4022_v2 = vpack.c.bf16 %v1514_v62, %v1511_v61  ;;  %v4032_v20 = vpack.c.bf16 %v1522_v11, %v1519_v17 }
 0x1f1   :  { %3308 = vmatpush3.bf16.xpose.msra.mxu1 %v1571_v55  ;;  %3311 = vmatprep.mubr.bf16.mxu1 %v1555_v30  ;;  %v3281_v55 = vpop.f32.mrb[92].mxu1 }
 0x1f2   :  { %v1138_v50 = vpop.f32.mrb[28].mxu0  ;;  %v1543_v21 = vadd.f32 %v3281_v55, %v3974_v45  ;;  %v1534_v35 = vpop.f32.mrb[93].mxu1 }
 0x1f3   :  { %v1140_v41 = vpop.f32.mrb[29].mxu0  ;;  %v1535_v24 = vadd.f32 %v3970_v29, %v1534_v35  ;;  %v3282_v49 = vpop.f32.mrb[94].mxu1 }
 0x1f4   :  { %v1142_v47 = vpop.f32.mrb[30].mxu0  ;;  %v1546_v22 = vadd.f32 %v3282_v49, %v3976_v52  ;;  %v1537_v56 = vpop.f32.mrb[95].mxu1 }
 0x1f5   :  { %v1556_v51 = vpack.c.bf16 %v1142_v47, %v1138_v50  ;;  %v1144_v25 = vpop.f32.mrb[31].mxu0  ;;  %v1538_v50 = vadd.f32 %v3972_v34, %v1537_v56 }
 0x1f6   :  { %v1572_v1 = vpack.c.bf16 %v1144_v25, %v1140_v41  ;;  %v4038_v40 = vpack.c.bf16 %v1546_v22, %v1543_v21 }
 0x1f7   :  { %v4040_v47 = vpack.c.bf16 %v1538_v50, %v1535_v24 }
 0x1f8   :  { %3309 = vmatprep.subr.bf16.mxu1 %v1572_v1 }
 0x1f9   :  { %3310 = vmatpush3.bf16.xpose.msra.mxu1 %v1572_v1 }
 0x1fa   :  { %v1148_v57 = vpop.f32.mrb[32].mxu0 }
 0x1fb   :  { %v1150_v59 = vpop.f32.mrb[33].mxu0 }
 0x1fc   :  { %v1152_v63 = vpop.f32.mrb[34].mxu0 }
 0x1fd   :  { %v1557_v3 = vpack.c.bf16 %v1152_v63, %v1148_v57  ;;  %v1154_v43 = vpop.f32.mrb[35].mxu0 }
 0x1fe   :  { %v1573_v16 = vpack.c.bf16 %v1154_v43, %v1150_v59 }
 0x200   :  { %3312 = vmatmul.mubr.bf16.vlgmr.msra.gmra.mrb[108].mxu1 %v1556_v51  ;;  %3315 = vmatprep.subr.bf16.mxu1 %v1573_v16 }
 0x201   :  { %3316 = vmatpush3.bf16.xpose.msra.mxu1 %v1573_v16  ;;  %3319 = vmatprep.mubr.bf16.mxu1 %v1557_v3 }
 0x202   :  { %v1158_v15 = vpop.f32.mrb[36].mxu0 }
 0x203   :  { %v1160_v38 = vpop.f32.mrb[37].mxu0 }
 0x204   :  { %v1162_v18 = vpop.f32.mrb[38].mxu0 }
 0x205   :  { %v1558_v28 = vpack.c.bf16 %v1162_v18, %v1158_v15  ;;  %v1164_v30 = vpop.f32.mrb[39].mxu0 }
 0x206   :  { %v1574_v23 = vpack.c.bf16 %v1164_v30, %v1160_v38 }
 0x208   :  { %3317 = vmatprep.subr.bf16.mxu1 %v1574_v23 }
 0x209   :  { %3318 = vmatpush3.bf16.xpose.msra.mxu1 %v1574_v23 }
 0x20a   :  { %v1168_v14 = vpop.f32.mrb[40].mxu0 }
 0x20b   :  { %v1170_v36 = vpop.f32.mrb[41].mxu0 }
 0x20c   :  { %v1172_v39 = vpop.f32.mrb[42].mxu0 }
 0x20d   :  { %v1559_v41 = vpack.c.bf16 %v1172_v39, %v1168_v14  ;;  %v1174_v46 = vpop.f32.mrb[43].mxu0 }
 0x20e   :  { %v1575_v45 = vpack.c.bf16 %v1174_v46, %v1170_v36 }
 0x210   :  { %3320 = vmatmul.mubr.bf16.vlgmr.msra.gmra.mrb[112].mxu1 %v1558_v28  ;;  %3323 = vmatprep.subr.bf16.mxu1 %v1575_v45 }
 0x211   :  { %3324 = vmatpush3.bf16.xpose.msra.mxu1 %v1575_v45  ;;  %3327 = vmatprep.mubr.bf16.mxu1 %v1559_v41 }
 0x212   :  { %v1178_v29 = vpop.f32.mrb[44].mxu0 }
 0x213   :  { %v1180_v51 = vpop.f32.mrb[45].mxu0 }
 0x214   :  { %v1182_v25 = vpop.f32.mrb[46].mxu0 }
 0x215   :  { %v1560_v52 = vpack.c.bf16 %v1182_v25, %v1178_v29  ;;  %v1184_v1 = vpop.f32.mrb[47].mxu0 }
 0x216   :  { %v1576_v32 = vpack.c.bf16 %v1184_v1, %v1180_v51 }
 0x218   :  { %3325 = vmatprep.subr.bf16.mxu1 %v1576_v32 }
 0x219   :  { %3326 = vmatpush3.bf16.xpose.msra.mxu1 %v1576_v32 }
 0x21a   :  { %v1188_v34 = vpop.f32.mrb[48].mxu0 }
 0x21b   :  { %v1190_v61 = vpop.f32.mrb[49].mxu0 }
 0x21c   :  { %v1192_v54 = vpop.f32.mrb[50].mxu0 }
 0x21d   :  { %v1561_v9 = vpack.c.bf16 %v1192_v54, %v1188_v34  ;;  %v1194_v26 = vpop.f32.mrb[51].mxu0 }
 0x21e   :  { %v1577_v57 = vpack.c.bf16 %v1194_v26, %v1190_v61 }
 0x21f   :  { %3335 = vmatprep.mubr.bf16.mxu0 %v1561_v9 }
 0x220   :  { %3328 = vmatmul.mubr.bf16.vlgmr.msra.gmra.mrb[116].mxu1 %v1560_v52  ;;  %3331 = vmatprep.subr.bf16.mxu0 %v1577_v57 }
 0x221   :  { %3332 = vmatpush3.bf16.xpose.msra.mxu0 %v1577_v57 }
 0x222   :  { %v1198_v62 = vpop.f32.mrb[52].mxu0 }
 0x223   :  { %v1200_v58 = vpop.f32.mrb[53].mxu0 }
 0x224   :  { %v1202_v59 = vpop.f32.mrb[54].mxu0 }
 0x225   :  { %v1562_v60 = vpack.c.bf16 %v1202_v59, %v1198_v62  ;;  %v1204_v63 = vpop.f32.mrb[55].mxu0 }
 0x226   :  { %v1578_v3 = vpack.c.bf16 %v1204_v63, %v1200_v58 }
 0x228   :  { %3333 = vmatprep.subr.bf16.mxu0 %v1578_v3 }
 0x229   :  { %3334 = vmatpush3.bf16.xpose.msra.mxu0 %v1578_v3 }
 0x22a   :  { %v1208_v43 = vpop.f32.mrb[56].mxu0  ;;  %3347 = vmatprep.subr.bf16.mxu0 %v3984_v27 }
 0x22b   :  { %v1210_v16 = vpop.f32.mrb[57].mxu0 }
 0x22c   :  { %v1212_v37 = vpop.f32.mrb[58].mxu0 }
 0x22d   :  { %v1563_v12 = vpack.c.bf16 %v1212_v37, %v1208_v43  ;;  %v1214_v6 = vpop.f32.mrb[59].mxu0 }
 0x22e   :  { %v1579_v17 = vpack.c.bf16 %v1214_v6, %v1210_v16 }
 0x22f   :  { %3343 = vmatprep.mubr.bf16.mxu1 %v1563_v12 }
 0x230   :  { %3336 = vmatmul.mubr.bf16.vlgmr.msra.gmra.mrb[64].mxu0 %v1562_v60  ;;  %3339 = vmatprep.subr.bf16.mxu1 %v1579_v17 }
 0x231   :  { %3340 = vmatpush3.bf16.xpose.msra.mxu1 %v1579_v17  ;;  %3348 = vmatpush3.bf16.msra.mxu0 %v3984_v27  ;;  %v1989_v27 = vlaneseq }
 0x232   :  { %v1218_v44 = vpop.f32.mrb[60].mxu0  ;;  %3349 = vmatprep.subr.bf16.mxu0 %v3982_v10 }
 0x233   :  { %v1220_v15 = vpop.f32.mrb[61].mxu0  ;;  %v1990_v18 = vshrl.u32 %v1989_v27, 7 }
 0x234   :  { %v1222_v7 = vpop.f32.mrb[62].mxu0 }
 0x235   :  { %v1564_v8 = vpack.c.bf16 %v1222_v7, %v1218_v44  ;;  %v1224_v38 = vpop.f32.mrb[63].mxu0  ;;  %3350 = vmatpush3.bf16.msra.mxu0 %v3982_v10  ;;  %v1992_v28 = vadd.s32 16, %v1990_v18  ;;  %v1995_v10 = vand.u32 127, %v1989_v27  ;;  %v1993_v30 = vadd.s32 24, %v1990_v18 }
 0x236   :  { %v1580_v11 = vpack.c.bf16 %v1224_v38, %v1220_v15  ;;  %3363 = vmatprep.subr.bf16.mxu0 %v4000_v4 }
 0x237   :  { %vm4052_vm0 = vcmp.le.s32.totalorder %v1995_v10, %v1992_v28  ;;  %vm4056_vm2 = vcmp.le.s32.totalorder %v1995_v10, %v1990_v18  ;;  %vm4060_vm3 = vcmp.le.s32.totalorder %v1995_v10, %v1993_v30 }
 0x238   :  { %3341 = vmatprep.subr.bf16.mxu1 %v1580_v11 }
 0x239   :  { %3342 = vmatpush3.bf16.xpose.msra.mxu1 %v1580_v11 }
 0x23a   :  { %3355 = vmatprep.subr.bf16.mxu1 %v3992_v48 }
 0x240   :  { %3344 = vmatmul.mubr.bf16.vlgmr.msra.gmra.mrb[120].mxu1 %v1564_v8 }
 0x241   :  { %3356 = vmatpush3.bf16.msra.mxu1 %v3992_v48 }
 0x242   :  { %3357 = vmatprep.subr.bf16.mxu1 %v3990_v42 }
 0x245   :  { %3358 = vmatpush3.bf16.msra.mxu1 %v3990_v42  ;;  %v1991_v42 = vadd.s32 8, %v1990_v18 }
 0x246   :  { %3371 = vmatprep.subr.bf16.mxu1 %v4008_v33 }
 0x247   :  { %vm4078_vm4 = vcmp.le.s32.totalorder %v1995_v10, %v1991_v42 }
 0x2a3   :  { %v3289_v55 = vpop.f32.mrb[96].mxu1 }
 0x2a4   :  { %v4066_v35 = vsel %vm4052_vm0, %v3289_v55, -inf  ;;  %v1631_v24 = vpop.f32.mrb[97].mxu1 }
 0x2a5   :  { %v3290_v49 = vpop.f32.mrb[98].mxu1  ;;  %v2047_v14 = vsel %vm2040_vm1, %v4066_v35, -inf  ;;  %v4072_v22 = vsel %vm4056_vm2, %v1631_v24, -inf }
 0x2a6   :  { %v4076_v56 = vsel %vm4060_vm3, %v3290_v49, -inf  ;;  %2048 = vmax.xlane.f32.xlu0 %v2047_v14  ;;  %v1634_v36 = vpop.f32.mrb[99].mxu1  ;;  %v2041_v41 = vsel %vm2040_vm1, %v4072_v22, -inf }
 0x2a7   :  { %v2050_v39 = vsel %vm2040_vm1, %v4076_v56, -inf  ;;  %v4088_v46 = vsel %vm4078_vm4, %v1634_v36, -inf }
 0x2a8   :  { %2051 = vmax.xlane.f32.xlu1 %v2050_v39  ;;  %v2044_v45 = vsel %vm2040_vm1, %v4088_v46, -inf }
 0x2aa   :  { %2042 = vmax.xlane.f32.xlu0 %v2041_v41 }
 0x2ae   :  { %2045 = vmax.xlane.f32.xlu0 %v2044_v45 }
 0x2b3   :  { %v3297_v29 = vpop.f32.mrb[100].mxu1 }
 0x2b4   :  { %v4094_v51 = vsel %vm4052_vm0, %v3297_v29, -inf  ;;  %v1680_v25 = vpop.f32.mrb[101].mxu1 }
 0x2b5   :  { %v4098_v52 = vsel %vm4056_vm2, %v1680_v25, -inf  ;;  %v3298_v1 = vpop.f32.mrb[102].mxu1  ;;  %v2059_v32 = vsel %vm2040_vm1, %v4094_v51, -inf }
 0x2b6   :  { %2060 = vmax.xlane.f32.xlu0 %v2059_v32  ;;  %v1683_v34 = vpop.f32.mrb[103].mxu1  ;;  %v2053_v61 = vsel %vm2040_vm1, %v4098_v52, -inf  ;;  %v4106_v54 = vsel %vm4060_vm3, %v3298_v1, -inf }
 0x2b7   :  { %2054 = vmax.xlane.f32.xlu1 %v2053_v61  ;;  %v2062_v9 = vsel %vm2040_vm1, %v4106_v54, -inf  ;;  %v4112_v26 = vsel %vm4078_vm4, %v1683_v34, -inf }
 0x2b8   :  { %v2056_v57 = vsel %vm2040_vm1, %v4112_v26, -inf }
 0x2bb   :  { %2063 = vmax.xlane.f32.xlu1 %v2062_v9 }
 0x2bf   :  { %2057 = vmax.xlane.f32.xlu1 %v2056_v57 }
 0x2c3   :  { %v3305_v62 = vpop.f32.mrb[104].mxu1 }
 0x2c4   :  { %v4118_v58 = vsel %vm4052_vm0, %v3305_v62, -inf  ;;  %v1729_v59 = vpop.f32.mrb[105].mxu1 }
 0x2c5   :  { %v3306_v60 = vpop.f32.mrb[106].mxu1  ;;  %v2071_v63 = vsel %vm2040_vm1, %v4118_v58, -inf  ;;  %v4124_v3 = vsel %vm4056_vm2, %v1729_v59, -inf }
 0x2c6   :  { %v4128_v43 = vsel %vm4060_vm3, %v3306_v60, -inf  ;;  %2072 = vmax.xlane.f32.xlu0 %v2071_v63  ;;  %v1732_v16 = vpop.f32.mrb[107].mxu1  ;;  %v2065_v6 = vsel %vm2040_vm1, %v4124_v3, -inf }
 0x2c7   :  { %v2074_v37 = vsel %vm2040_vm1, %v4128_v43, -inf  ;;  %v4134_v12 = vsel %vm4078_vm4, %v1732_v16, -inf }
 0x2c8   :  { %2075 = vmax.xlane.f32.xlu1 %v2074_v37  ;;  %v2068_v17 = vsel %vm2040_vm1, %v4134_v12, -inf }
 0x2ca   :  { %2066 = vmax.xlane.f32.xlu0 %v2065_v6 }
 0x2cc   :  { %2069 = vmax.xlane.f32.xlu1 %v2068_v17 }
 0x2d3   :  { %v3313_v44 = vpop.f32.mrb[108].mxu1 }
 0x2d4   :  { %v4142_v15 = vsel %vm4052_vm0, %v3313_v44, -inf  ;;  %v1778_v7 = vpop.f32.mrb[109].mxu1 }
 0x2d5   :  { %v3314_v8 = vpop.f32.mrb[110].mxu1  ;;  %v2083_v38 = vsel %vm2040_vm1, %v4142_v15, -inf  ;;  %v4148_v11 = vsel %vm4056_vm2, %v1778_v7, -inf }
 0x2d6   :  { %v4152_v27 = vsel %vm4060_vm3, %v3314_v8, -inf  ;;  %2084 = vmax.xlane.f32.xlu0 %v2083_v38  ;;  %v1781_v18 = vpop.f32.mrb[111].mxu1  ;;  %v2077_v30 = vsel %vm2040_vm1, %v4148_v11, -inf }
 0x2d7   :  { %v2086_v28 = vsel %vm2040_vm1, %v4152_v27, -inf  ;;  %v4158_v10 = vsel %vm4078_vm4, %v1781_v18, -inf }
 0x2d8   :  { %2087 = vmax.xlane.f32.xlu1 %v2086_v28  ;;  %v2080_v55 = vsel %vm2040_vm1, %v4158_v10, -inf }
 0x2da   :  { %2078 = vmax.xlane.f32.xlu0 %v2077_v30 }
 0x2dc   :  { %2081 = vmax.xlane.f32.xlu1 %v2080_v55 }
 0x2e3   :  { %v3321_v42 = vpop.f32.mrb[112].mxu1 }
 0x2e4   :  { %v4166_v24 = vsel %vm4052_vm0, %v3321_v42, -inf  ;;  %v1827_v49 = vpop.f32.mrb[113].mxu1 }
 0x2e5   :  { %v3322_v14 = vpop.f32.mrb[114].mxu1  ;;  %v2095_v36 = vsel %vm2040_vm1, %v4166_v24, -inf  ;;  %v4172_v39 = vsel %vm4056_vm2, %v1827_v49, -inf }
 0x2e6   :  { %v4176_v41 = vsel %vm4060_vm3, %v3322_v14, -inf  ;;  %2096 = vmax.xlane.f32.xlu0 %v2095_v36  ;;  %v1830_v45 = vpop.f32.mrb[115].mxu1  ;;  %v2089_v1 = vsel %vm2040_vm1, %v4172_v39, -inf }
 0x2e7   :  { %v2098_v29 = vsel %vm2040_vm1, %v4176_v41, -inf  ;;  %v4182_v25 = vsel %vm4078_vm4, %v1830_v45, -inf }
 0x2e8   :  { %2099 = vmax.xlane.f32.xlu1 %v2098_v29  ;;  %v2092_v32 = vsel %vm2040_vm1, %v4182_v25, -inf }
 0x2ea   :  { %2090 = vmax.xlane.f32.xlu0 %v2089_v1 }
 0x2ec   :  { %2093 = vmax.xlane.f32.xlu1 %v2092_v32 }
 0x2f3   :  { %v3329_v34 = vpop.f32.mrb[116].mxu1 }
 0x2f4   :  { %v4190_v61 = vsel %vm4052_vm0, %v3329_v34, -inf  ;;  %v1876_v9 = vpop.f32.mrb[117].mxu1 }
 0x2f5   :  { %v3330_v57 = vpop.f32.mrb[118].mxu1  ;;  %v2107_v62 = vsel %vm2040_vm1, %v4190_v61, -inf  ;;  %v4196_v59 = vsel %vm4056_vm2, %v1876_v9, -inf }
 0x2f6   :  { %v4200_v60 = vsel %vm4060_vm3, %v3330_v57, -inf  ;;  %2108 = vmax.xlane.f32.xlu0 %v2107_v62  ;;  %v1879_v63 = vpop.f32.mrb[119].mxu1  ;;  %v2101_v6 = vsel %vm2040_vm1, %v4196_v59, -inf }
 0x2f7   :  { %v2110_v16 = vsel %vm2040_vm1, %v4200_v60, -inf  ;;  %v4206_v37 = vsel %vm4078_vm4, %v1879_v63, -inf }
 0x2f8   :  { %2111 = vmax.xlane.f32.xlu1 %v2110_v16  ;;  %v2104_v17 = vsel %vm2040_vm1, %v4206_v37, -inf }
 0x2fa   :  { %2102 = vmax.xlane.f32.xlu0 %v2101_v6 }
 0x2fc   :  { %2105 = vmax.xlane.f32.xlu1 %v2104_v17 }
 0x303   :  { %v3337_v44 = vpop.f32.mrb[64].mxu0 }
 0x304   :  { %v4214_v7 = vsel %vm4052_vm0, %v3337_v44, -inf  ;;  %v1925_v8 = vpop.f32.mrb[65].mxu0 }
 0x305   :  { %v3338_v38 = vpop.f32.mrb[66].mxu0  ;;  %v2119_v18 = vsel %vm2040_vm1, %v4214_v7, -inf  ;;  %v4220_v28 = vsel %vm4056_vm2, %v1925_v8, -inf }
 0x306   :  { %v4224_v30 = vsel %vm4060_vm3, %v3338_v38, -inf  ;;  %2120 = vmax.xlane.f32.xlu0 %v2119_v18  ;;  %v1928_v55 = vpop.f32.mrb[67].mxu0  ;;  %v2113_v14 = vsel %vm2040_vm1, %v4220_v28, -inf }
 0x307   :  { %v2122_v42 = vsel %vm2040_vm1, %v4224_v30, -inf  ;;  %v4230_v49 = vsel %vm4078_vm4, %v1928_v55, -inf }
 0x308   :  { %2123 = vmax.xlane.f32.xlu1 %v2122_v42  ;;  %v2116_v36 = vsel %vm2040_vm1, %v4230_v49, -inf }
 0x30a   :  { %2114 = vmax.xlane.f32.xlu0 %v2113_v14 }
 0x30c   :  { %2117 = vmax.xlane.f32.xlu1 %v2116_v36 }
 0x313   :  { %v3345_v45 = vpop.f32.mrb[120].mxu1 }
 0x314   :  { %v1974_v29 = vpop.f32.mrb[121].mxu1  ;;  %v4244_v57 = vsel %vm4052_vm0, %v3345_v45, -inf }
 0x315   :  { %v4238_v1 = vsel %vm4056_vm2, %v1974_v29, -inf  ;;  %v3346_v32 = vpop.f32.mrb[122].mxu1  ;;  %v2131_v16 = vsel %vm2040_vm1, %v4244_v57, -inf }
 0x316   :  { %v1977_v34 = vpop.f32.mrb[123].mxu1  ;;  %v2125_v9 = vsel %vm2040_vm1, %v4238_v1, -inf  ;;  %v4254_v21 = vsel %vm4060_vm3, %v3346_v32, -inf }
 0x317   :  { %v4248_v62 = vsel %vm4078_vm4, %v1977_v34, -inf  ;;  %2126 = vmax.xlane.f32.xlu0 %v2125_v9  ;;  %v2134_v23 = vsel %vm2040_vm1, %v4254_v21, -inf }
 0x318   :  { %v2128_v63 = vsel %vm2040_vm1, %v4248_v62, -inf }
 0x319   :  { %2129 = vmax.xlane.f32.xlu1 %v2128_v63 }
 0x31b   :  { %2132 = vmax.xlane.f32.xlu0 %v2131_v16 }
 0x31d   :  { %2135 = vmax.xlane.f32.xlu1 %v2134_v23 }
 0x333   :  { %v2049_v50 = vpop.xlane.xlu0 %2048 }
 0x334   :  { %v2139_v6 = vsub.f32 %v4066_v35, %v2049_v50 }
 0x335   :  { %v2052_v17 = vpop.xlane.xlu1 %2051 }
 0x336   :  { %v2173_v44 = vmul.f32 1.442695, %v2139_v6  ;;  %v2140_v8 = vsub.f32 %v4076_v56, %v2052_v17 }
 0x337   :  { %v2043_v38 = vpop.xlane.xlu0 %2042 }
 0x338   :  { %3643 = vpow2.f32 %v2173_v44  ;;  %v2175_v48 = vmul.f32 1.442695, %v2140_v8  ;;  %v2137_v18 = vsub.f32 %v4072_v22, %v2043_v38 }
 0x33a   :  { %3645 = vpow2.f32 %v2175_v48  ;;  %v2169_v55 = vmul.f32 1.442695, %v2137_v18 }
 0x33b   :  { %v2046_v42 = vpop.xlane.xlu0 %2045 }
 0x33c   :  { %3647 = vpow2.f32 %v2169_v55  ;;  %v2138_v14 = vsub.f32 %v4088_v46, %v2046_v42 }
 0x33e   :  { %v2171_v36 = vmul.f32 1.442695, %v2138_v14 }
 0x340   :  { %3649 = vpow2.f32 %v2171_v36 }
 0x342   :  { %v4264_v45 = vpop.eup %3643 }
 0x343   :  { %v2061_v35 = vpop.xlane.xlu0 %2060  ;;  %v2239_v29 = vsel %vm2040_vm1, %v4264_v45, 0.0 }
 0x344   :  { %v4268_v56 = vpop.eup %3645  ;;  %v2143_v32 = vsub.f32 %v4094_v51, %v2061_v35  ;;  %v2055_v34 = vpop.xlane.xlu1 %2054  ;;  %2240 = vadd.xlane.f32.xlu0 %v2239_v29 }
 0x345   :  { %v2141_v22 = vsub.f32 %v4098_v52, %v2055_v34  ;;  %v2242_v9 = vsel %vm2040_vm1, %v4268_v56, 0.0 }
 0x346   :  { %v4274_v46 = vpop.eup %3647  ;;  %v2181_v63 = vmul.f32 1.442695, %v2143_v32  ;;  %2243 = vadd.xlane.f32.xlu1 %v2242_v9 }
 0x347   :  { %v2177_v16 = vmul.f32 1.442695, %v2141_v22  ;;  %v2233_v23 = vsel %vm2040_vm1, %v4274_v46, 0.0 }
 0x348   :  { %3651 = vpow2.f32 %v2181_v63  ;;  %v2064_v50 = vpop.xlane.xlu1 %2063  ;;  %2234 = vadd.xlane.f32.xlu0 %v2233_v23 }
 0x349   :  { %v2144_v51 = vsub.f32 %v4106_v54, %v2064_v50  ;;  %3653 = vpow2.f32 %v2177_v16 }
 0x34a   :  { %v4279_v6 = vpop.eup %3649 }
 0x34b   :  { %v2183_v52 = vmul.f32 1.442695, %v2144_v51  ;;  %v2236_v17 = vsel %vm2040_vm1, %v4279_v6, 0.0 }
 0x34c   :  { %v2058_v44 = vpop.xlane.xlu1 %2057  ;;  %2237 = vadd.xlane.f32.xlu1 %v2236_v17 }
 0x34d   :  { %3655 = vpow2.f32 %v2183_v52  ;;  %v2142_v8 = vsub.f32 %v4112_v26, %v2058_v44 }
 0x34f   :  { %v2179_v38 = vmul.f32 1.442695, %v2142_v8 }
 0x351   :  { %3657 = vpow2.f32 %v2179_v38 }
 0x352   :  { %v4284_v48 = vpop.eup %3651 }
 0x353   :  { %v2073_v18 = vpop.xlane.xlu0 %2072  ;;  %v2251_v54 = vsel %vm2040_vm1, %v4284_v48, 0.0  ;;  %v4288_v55 = vpop.eup %3653 }
 0x354   :  { %v2147_v42 = vsub.f32 %v4118_v58, %v2073_v18  ;;  %2252 = vadd.xlane.f32.xlu0 %v2251_v54  ;;  %v2245_v32 = vsel %vm2040_vm1, %v4288_v55, 0.0 }
 0x355   :  { %v2076_v14 = vpop.xlane.xlu1 %2075 }
 0x356   :  { %v2189_v36 = vmul.f32 1.442695, %v2147_v42  ;;  %v2148_v35 = vsub.f32 %v4128_v43, %v2076_v14 }
 0x357   :  { %v4292_v29 = vpop.eup %3655  ;;  %v2067_v26 = vpop.xlane.xlu0 %2066 }
 0x358   :  { %3659 = vpow2.f32 %v2189_v36  ;;  %v2191_v34 = vmul.f32 1.442695, %v2148_v35  ;;  %v2145_v22 = vsub.f32 %v4124_v3, %v2067_v26  ;;  %2246 = vadd.xlane.f32.xlu0 %v2245_v32  ;;  %v2254_v9 = vsel %vm2040_vm1, %v4292_v29, 0.0 }
 0x359   :  { %v2070_v58 = vpop.xlane.xlu1 %2069  ;;  %2255 = vadd.xlane.f32.xlu1 %v2254_v9 }
 0x35a   :  { %3661 = vpow2.f32 %v2191_v34  ;;  %v2185_v63 = vmul.f32 1.442695, %v2145_v22  ;;  %v2146_v43 = vsub.f32 %v4134_v12, %v2070_v58 }
 0x35b   :  { %v4300_v16 = vpop.eup %3657 }
 0x35c   :  { %3663 = vpow2.f32 %v2185_v63  ;;  %v2187_v23 = vmul.f32 1.442695, %v2146_v43  ;;  %v2248_v50 = vsel %vm2040_vm1, %v4300_v16, 0.0 }
 0x35d   :  { %2249 = vadd.xlane.f32.xlu1 %v2248_v50 }
 0x35e   :  { %3665 = vpow2.f32 %v2187_v23 }
 0x362   :  { %v4304_v3 = vpop.eup %3659 }
 0x363   :  { %v2085_v51 = vpop.xlane.xlu0 %2084  ;;  %v2263_v52 = vsel %vm2040_vm1, %v4304_v3, 0.0 }
 0x364   :  { %v4308_v17 = vpop.eup %3661  ;;  %v2151_v44 = vsub.f32 %v4142_v15, %v2085_v51  ;;  %2264 = vadd.xlane.f32.xlu0 %v2263_v52 }
 0x365   :  { %v2088_v12 = vpop.xlane.xlu1 %2087  ;;  %v2266_v8 = vsel %vm2040_vm1, %v4308_v17, 0.0 }
 0x366   :  { %v4313_v38 = vpop.eup %3663  ;;  %v2197_v18 = vmul.f32 1.442695, %v2151_v44  ;;  %v2152_v54 = vsub.f32 %v4152_v27, %v2088_v12  ;;  %2267 = vadd.xlane.f32.xlu1 %v2266_v8 }
 0x367   :  { %v2079_v42 = vpop.xlane.xlu0 %2078  ;;  %v2257_v14 = vsel %vm2040_vm1, %v4313_v38, 0.0 }
 0x368   :  { %v4318_v36 = vpop.eup %3665  ;;  %3667 = vpow2.f32 %v2197_v18  ;;  %v2199_v35 = vmul.f32 1.442695, %v2152_v54  ;;  %v2149_v15 = vsub.f32 %v4148_v11, %v2079_v42  ;;  %2258 = vadd.xlane.f32.xlu0 %v2257_v14 }
 0x369   :  { %v2082_v26 = vpop.xlane.xlu1 %2081  ;;  %v2260_v32 = vsel %vm2040_vm1, %v4318_v36, 0.0 }
 0x36a   :  { %3669 = vpow2.f32 %v2199_v35  ;;  %v2193_v34 = vmul.f32 1.442695, %v2149_v15  ;;  %v2150_v27 = vsub.f32 %v4158_v10, %v2082_v26  ;;  %2261 = vadd.xlane.f32.xlu1 %v2260_v32 }
 0x36c   :  { %3671 = vpow2.f32 %v2193_v34  ;;  %v2195_v22 = vmul.f32 1.442695, %v2150_v27 }
 0x36e   :  { %3673 = vpow2.f32 %v2195_v22 }
 0x372   :  { %v4324_v9 = vpop.eup %3667 }
 0x373   :  { %v2097_v58 = vpop.xlane.xlu0 %2096  ;;  %v2275_v63 = vsel %vm2040_vm1, %v4324_v9, 0.0 }
 0x374   :  { %v4328_v11 = vpop.eup %3669  ;;  %v2155_v43 = vsub.f32 %v4166_v24, %v2097_v58  ;;  %2276 = vadd.xlane.f32.xlu0 %v2275_v63 }
 0x375   :  { %v2100_v23 = vpop.xlane.xlu1 %2099  ;;  %v2278_v50 = vsel %vm2040_vm1, %v4328_v11, 0.0 }
 0x376   :  { %v4333_v10 = vpop.eup %3671  ;;  %v2205_v51 = vmul.f32 1.442695, %v2155_v43  ;;  %v2156_v52 = vsub.f32 %v4176_v41, %v2100_v23  ;;  %2279 = vadd.xlane.f32.xlu1 %v2278_v50 }
 0x377   :  { %v2091_v44 = vpop.xlane.xlu0 %2090  ;;  %v2269_v12 = vsel %vm2040_vm1, %v4333_v10, 0.0 }
 0x378   :  { %v4338_v8 = vpop.eup %3673  ;;  %3675 = vpow2.f32 %v2205_v51  ;;  %v2207_v18 = vmul.f32 1.442695, %v2156_v52  ;;  %v2153_v24 = vsub.f32 %v4172_v39, %v2091_v44  ;;  %2270 = vadd.xlane.f32.xlu0 %v2269_v12 }
 0x379   :  { %v2094_v54 = vpop.xlane.xlu1 %2093  ;;  %v2272_v42 = vsel %vm2040_vm1, %v4338_v8, 0.0 }
 0x37a   :  { %3677 = vpow2.f32 %v2207_v18  ;;  %v2201_v14 = vmul.f32 1.442695, %v2153_v24  ;;  %v2154_v41 = vsub.f32 %v4182_v25, %v2094_v54  ;;  %2273 = vadd.xlane.f32.xlu1 %v2272_v42 }
 0x37c   :  { %3679 = vpow2.f32 %v2201_v14  ;;  %v2203_v35 = vmul.f32 1.442695, %v2154_v41 }
 0x37e   :  { %3681 = vpow2.f32 %v2203_v35 }
 0x382   :  { %v4344_v15 = vpop.eup %3675 }
 0x383   :  { %v2109_v26 = vpop.xlane.xlu0 %2108  ;;  %v2287_v32 = vsel %vm2040_vm1, %v4344_v15, 0.0 }
 0x384   :  { %v4348_v39 = vpop.eup %3677  ;;  %v2159_v34 = vsub.f32 %v4190_v61, %v2109_v26  ;;  %2288 = vadd.xlane.f32.xlu0 %v2287_v32 }
 0x385   :  { %v2112_v27 = vpop.xlane.xlu1 %2111  ;;  %v2290_v22 = vsel %vm2040_vm1, %v4348_v39, 0.0 }
 0x386   :  { %v4353_v25 = vpop.eup %3679  ;;  %v2213_v58 = vmul.f32 1.442695, %v2159_v34  ;;  %v2160_v63 = vsub.f32 %v4200_v60, %v2112_v27  ;;  %2291 = vadd.xlane.f32.xlu1 %v2290_v22 }
 0x387   :  { %v2103_v43 = vpop.xlane.xlu0 %2102  ;;  %v2281_v23 = vsel %vm2040_vm1, %v4353_v25, 0.0 }
 0x388   :  { %v4358_v50 = vpop.eup %3681  ;;  %3683 = vpow2.f32 %v2213_v58  ;;  %v2215_v51 = vmul.f32 1.442695, %v2160_v63  ;;  %v2157_v61 = vsub.f32 %v4196_v59, %v2103_v43  ;;  %2282 = vadd.xlane.f32.xlu0 %v2281_v23 }
 0x389   :  { %v2106_v52 = vpop.xlane.xlu1 %2105  ;;  %v2284_v44 = vsel %vm2040_vm1, %v4358_v50, 0.0 }
 0x38a   :  { %3685 = vpow2.f32 %v2215_v51  ;;  %v2209_v12 = vmul.f32 1.442695, %v2157_v61  ;;  %v2158_v60 = vsub.f32 %v4206_v37, %v2106_v52  ;;  %2285 = vadd.xlane.f32.xlu1 %v2284_v44 }
 0x38c   :  { %3687 = vpow2.f32 %v2209_v12  ;;  %v2211_v18 = vmul.f32 1.442695, %v2158_v60 }
 0x38e   :  { %3689 = vpow2.f32 %v2211_v18 }
 0x392   :  { %v4364_v24 = vpop.eup %3683 }
 0x393   :  { %v2121_v54 = vpop.xlane.xlu0 %2120  ;;  %v2299_v42 = vsel %vm2040_vm1, %v4364_v24, 0.0 }
 0x394   :  { %v4368_v59 = vpop.eup %3685  ;;  %v2163_v14 = vsub.f32 %v4214_v7, %v2121_v54  ;;  %2300 = vadd.xlane.f32.xlu0 %v2299_v42 }
 0x395   :  { %v2124_v41 = vpop.xlane.xlu1 %2123  ;;  %v2302_v35 = vsel %vm2040_vm1, %v4368_v59, 0.0 }
 0x396   :  { %v4373_v37 = vpop.eup %3687  ;;  %v2221_v26 = vmul.f32 1.442695, %v2163_v14  ;;  %v2164_v32 = vsub.f32 %v4224_v30, %v2124_v41  ;;  %2303 = vadd.xlane.f32.xlu1 %v2302_v35 }
 0x397   :  { %v2115_v34 = vpop.xlane.xlu0 %2114  ;;  %v2293_v27 = vsel %vm2040_vm1, %v4373_v37, 0.0 }
 0x398   :  { %v4378_v22 = vpop.eup %3689  ;;  %3691 = vpow2.f32 %v2221_v26  ;;  %v2223_v58 = vmul.f32 1.442695, %v2164_v32  ;;  %v2161_v7 = vsub.f32 %v4220_v28, %v2115_v34  ;;  %2294 = vadd.xlane.f32.xlu0 %v2293_v27 }
 0x399   :  { %v2118_v63 = vpop.xlane.xlu1 %2117  ;;  %v2296_v43 = vsel %vm2040_vm1, %v4378_v22, 0.0 }
 0x39a   :  { %3693 = vpow2.f32 %v2223_v58  ;;  %v2217_v23 = vmul.f32 1.442695, %v2161_v7  ;;  %v2162_v30 = vsub.f32 %v4230_v49, %v2118_v63  ;;  %2297 = vadd.xlane.f32.xlu1 %v2296_v43 }
 0x39c   :  { %3695 = vpow2.f32 %v2217_v23  ;;  %v2219_v51 = vmul.f32 1.442695, %v2162_v30 }
 0x39e   :  { %3697 = vpow2.f32 %v2219_v51 }
 0x3a2   :  { %v4384_v61 = vpop.eup %3691 }
 0x3a3   :  { %v2311_v52 = vsel %vm2040_vm1, %v4384_v61, 0.0 }
 0x3a4   :  { %v4388_v44 = vpop.eup %3693  ;;  %2312 = vadd.xlane.f32.xlu0 %v2311_v52  ;;  %v2127_v28 = vpop.xlane.xlu0 %2126 }
 0x3a5   :  { %v2165_v12 = vsub.f32 %v4238_v1, %v2127_v28  ;;  %v2314_v60 = vsel %vm2040_vm1, %v4388_v44, 0.0 }
 0x3a6   :  { %v4393_v18 = vpop.eup %3695  ;;  %2315 = vadd.xlane.f32.xlu1 %v2314_v60  ;;  %v2130_v49 = vpop.xlane.xlu1 %2129 }
 0x3a7   :  { %v2225_v54 = vmul.f32 1.442695, %v2165_v12  ;;  %v2166_v42 = vsub.f32 %v4248_v62, %v2130_v49  ;;  %v2305_v14 = vsel %vm2040_vm1, %v4393_v18, 0.0 }
 0x3a8   :  { %v4398_v41 = vpop.eup %3697  ;;  %2306 = vadd.xlane.f32.xlu0 %v2305_v14  ;;  %v2133_v35 = vpop.xlane.xlu0 %2132 }
 0x3a9   :  { %3699 = vpow2.f32 %v2225_v54  ;;  %v2227_v26 = vmul.f32 1.442695, %v2166_v42  ;;  %v2167_v1 = vsub.f32 %v4244_v57, %v2133_v35  ;;  %v2308_v32 = vsel %vm2040_vm1, %v4398_v41, 0.0 }
 0x3aa   :  { %2309 = vadd.xlane.f32.xlu1 %v2308_v32  ;;  %v2136_v34 = vpop.xlane.xlu1 %2135 }
 0x3ab   :  { %3701 = vpow2.f32 %v2227_v26  ;;  %v2229_v27 = vmul.f32 1.442695, %v2167_v1  ;;  %v2168_v62 = vsub.f32 %v4254_v21, %v2136_v34 }
 0x3ad   :  { %3703 = vpow2.f32 %v2229_v27  ;;  %v2231_v58 = vmul.f32 1.442695, %v2168_v62 }
 0x3af   :  { %3705 = vpow2.f32 %v2231_v58 }
 0x3b3   :  { %v4404_v7 = vpop.eup %3699 }
 0x3b4   :  { %v2317_v63 = vsel %vm2040_vm1, %v4404_v7, 0.0 }
 0x3b5   :  { %v4408_v43 = vpop.eup %3701  ;;  %2318 = vadd.xlane.f32.xlu0 %v2317_v63 }
 0x3b6   :  { %v2320_v57 = vsel %vm2040_vm1, %v4408_v43, 0.0 }
 0x3b7   :  { %v4412_v23 = vpop.eup %3703  ;;  %2321 = vadd.xlane.f32.xlu1 %v2320_v57 }
 0x3b8   :  { %v2323_v21 = vsel %vm2040_vm1, %v4412_v23, 0.0 }
 0x3b9   :  { %v4416_v30 = vpop.eup %3705  ;;  %2324 = vadd.xlane.f32.xlu0 %v2323_v21 }
 0x3ba   :  { %v2326_v51 = vsel %vm2040_vm1, %v4416_v30, 0.0 }
 0x3bb   :  { %2327 = vadd.xlane.f32.xlu1 %v2326_v51 }
 0x3d1   :  { %v2241_v52 = vpop.xlane.xlu0 %2240 }
 0x3d3   :  { %v2244_v28 = vpop.xlane.xlu1 %2243 }
 0x3d4   :  { %3707 = vrcp.f32 %v2244_v28 }
 0x3d5   :  { %v2235_v12 = vpop.xlane.xlu0 %2234 }
 0x3d6   :  { %3709 = vrcp.f32 %v2235_v12 }
 0x3d7   :  { %3711 = vrcp.f32 %v2241_v52 }
 0x3d9   :  { %v2238_v60 = vpop.xlane.xlu1 %2237 }
 0x3da   :  { %3713 = vrcp.f32 %v2238_v60 }
 0x3de   :  { %v3708_v49 = vpop.eup %3707 }
 0x3df   :  { %v2364_v26 = vmul.f32 %v3708_v49, %v4268_v56 }
 0x3e0   :  { %v3710_v42 = vpop.eup %3709 }
 0x3e1   :  { %v2253_v54 = vpop.xlane.xlu0 %2252  ;;  %v3712_v14 = vpop.eup %3711  ;;  %v2361_v1 = vmul.f32 %v3710_v42, %v4274_v46 }
 0x3e2   :  { %v2363_v34 = vmul.f32 %v3712_v14, %v4264_v45 }
 0x3e4   :  { %v3714_v35 = vpop.eup %3713  ;;  %v2394_v63 = vpack.c.bf16 %v2364_v26, %v2363_v34 }
 0x3e5   :  { %v2362_v32 = vmul.f32 %v3714_v35, %v4279_v6  ;;  %v2247_v27 = vpop.xlane.xlu0 %2246 }
 0x3e6   :  { %v2256_v62 = vpop.xlane.xlu1 %2255 }
 0x3e7   :  { %v2393_v58 = vpack.c.bf16 %v2362_v32, %v2361_v1  ;;  %3715 = vrcp.f32 %v2256_v62 }
 0x3e8   :  { %3717 = vrcp.f32 %v2247_v27 }
 0x3e9   :  { %3351 = vmatprep.mubr.msk.bf16.mxu0 %vm2040_vm1, %v2393_v58  ;;  %3719 = vrcp.f32 %v2253_v54 }
 0x3ea   :  { %3352 = vmatmul.mubr.msk.bf16.vlgmr.msra.gmra.mrb[68].mxu0 %vm2040_vm1, %v2394_v63  ;;  %v2250_v57 = vpop.xlane.xlu1 %2249 }
 0x3eb   :  { %3364 = vmatpush3.bf16.msra.mxu0 %v4000_v4  ;;  %3721 = vrcp.f32 %v2250_v57 }
 0x3ec   :  { %3365 = vmatprep.subr.bf16.mxu0 %v3998_v0 }
 0x3ef   :  { %3366 = vmatpush3.bf16.msra.mxu0 %v3998_v0 }
 0x3f0   :  { %3379 = vmatprep.subr.bf16.mxu0 %v4016_v53 }
 0x3f1   :  { %v2265_v45 = vpop.xlane.xlu0 %2264  ;;  %v3716_v56 = vpop.eup %3715 }
 0x3f2   :  { %v3718_v46 = vpop.eup %3717  ;;  %v2368_v52 = vmul.f32 %v3716_v56, %v4292_v29 }
 0x3f3   :  { %v2268_v6 = vpop.xlane.xlu1 %2267  ;;  %v3720_v21 = vpop.eup %3719  ;;  %v2365_v4 = vmul.f32 %v3718_v46, %v4288_v55 }
 0x3f4   :  { %3723 = vrcp.f32 %v2268_v6  ;;  %v2367_v60 = vmul.f32 %v3720_v21, %v4284_v48 }
 0x3f5   :  { %v3722_v51 = vpop.eup %3721  ;;  %v2259_v28 = vpop.xlane.xlu0 %2258 }
 0x3f6   :  { %3725 = vrcp.f32 %v2259_v28  ;;  %v2366_v12 = vmul.f32 %v3722_v51, %v4300_v16  ;;  %v2396_v54 = vpack.c.bf16 %v2368_v52, %v2367_v60 }
 0x3f7   :  { %3727 = vrcp.f32 %v2265_v45  ;;  %v2262_v0 = vpop.xlane.xlu1 %2261 }
 0x3f8   :  { %3729 = vrcp.f32 %v2262_v0  ;;  %v2395_v49 = vpack.c.bf16 %v2366_v12, %v2365_v4 }
 0x3fa   :  { %3359 = vmatprep.mubr.msk.bf16.mxu1 %vm2040_vm1, %v2395_v49 }
 0x3fb   :  { %3360 = vmatmul.mubr.msk.bf16.vlgmr.msra.gmra.mrb[124].mxu1 %vm2040_vm1, %v2396_v54 }
 0x3fc   :  { %3372 = vmatpush3.bf16.msra.mxu1 %v4008_v33 }
 0x3fd   :  { %3373 = vmatprep.subr.bf16.mxu1 %v4006_v13 }
 0x3fe   :  { %v3724_v29 = vpop.eup %3723 }
 0x3ff   :  { %v2372_v14 = vmul.f32 %v3724_v29, %v4308_v17 }
 0x400   :  { %v3726_v42 = vpop.eup %3725  ;;  %3374 = vmatpush3.bf16.msra.mxu1 %v4006_v13 }
 0x401   :  { %v3728_v55 = vpop.eup %3727  ;;  %3387 = vmatprep.subr.bf16.mxu1 %v4024_v5  ;;  %v2277_v48 = vpop.xlane.xlu0 %2276  ;;  %v2369_v26 = vmul.f32 %v3726_v42, %v4313_v38 }
 0x402   :  { %v3730_v16 = vpop.eup %3729  ;;  %v2371_v33 = vmul.f32 %v3728_v55, %v4304_v3 }
 0x403   :  { %v2280_v35 = vpop.xlane.xlu1 %2279  ;;  %v2370_v1 = vmul.f32 %v3730_v16, %v4318_v36 }
 0x404   :  { %3731 = vrcp.f32 %v2280_v35  ;;  %v2398_v27 = vpack.c.bf16 %v2372_v14, %v2371_v33 }
 0x405   :  { %v2271_v32 = vpop.xlane.xlu0 %2270  ;;  %v2397_v34 = vpack.c.bf16 %v2370_v1, %v2369_v26 }
 0x406   :  { %3733 = vrcp.f32 %v2271_v32 }
 0x407   :  { %3735 = vrcp.f32 %v2277_v48  ;;  %3367 = vmatprep.mubr.msk.bf16.mxu0 %vm2040_vm1, %v2397_v34  ;;  %v2274_v13 = vpop.xlane.xlu1 %2273 }
 0x408   :  { %3737 = vrcp.f32 %v2274_v13  ;;  %3368 = vmatmul.mubr.msk.bf16.vlgmr.msra.gmra.mrb[72].mxu0 %vm2040_vm1, %v2398_v27 }
 0x409   :  { %3380 = vmatpush3.bf16.msra.mxu0 %v4016_v53 }
 0x40a   :  { %3381 = vmatprep.subr.bf16.mxu0 %v4014_v31 }
 0x40d   :  { %3382 = vmatpush3.bf16.msra.mxu0 %v4014_v31 }
 0x40e   :  { %3395 = vmatprep.subr.bf16.mxu0 %v4032_v20  ;;  %v3732_v3 = vpop.eup %3731 }
 0x40f   :  { %v2376_v58 = vmul.f32 %v3732_v3, %v4328_v11 }
 0x410   :  { %v3734_v17 = vpop.eup %3733 }
 0x411   :  { %v3736_v38 = vpop.eup %3735  ;;  %v2289_v36 = vpop.xlane.xlu0 %2288  ;;  %v2373_v57 = vmul.f32 %v3734_v17, %v4333_v10 }
 0x412   :  { %v3738_v62 = vpop.eup %3737  ;;  %v2375_v53 = vmul.f32 %v3736_v38, %v4324_v9 }
 0x413   :  { %v2292_v63 = vpop.xlane.xlu1 %2291  ;;  %v2374_v45 = vmul.f32 %v3738_v62, %v4338_v8 }
 0x414   :  { %3739 = vrcp.f32 %v2292_v63  ;;  %v2400_v31 = vpack.c.bf16 %v2376_v58, %v2375_v53 }
 0x415   :  { %v2283_v56 = vpop.xlane.xlu0 %2282  ;;  %v2399_v46 = vpack.c.bf16 %v2374_v45, %v2373_v57 }
 0x416   :  { %3741 = vrcp.f32 %v2283_v56 }
 0x417   :  { %3743 = vrcp.f32 %v2289_v36  ;;  %3375 = vmatprep.mubr.msk.bf16.mxu1 %vm2040_vm1, %v2399_v46  ;;  %v2286_v6 = vpop.xlane.xlu1 %2285 }
 0x418   :  { %3745 = vrcp.f32 %v2286_v6  ;;  %3376 = vmatmul.mubr.msk.bf16.vlgmr.msra.gmra.mrb[128].mxu1 %vm2040_vm1, %v2400_v31 }
 0x419   :  { %3388 = vmatpush3.bf16.msra.mxu1 %v4024_v5 }
 0x41a   :  { %3389 = vmatprep.subr.bf16.mxu1 %v4022_v2 }
 0x41d   :  { %3390 = vmatpush3.bf16.msra.mxu1 %v4022_v2 }
 0x41e   :  { %3403 = vmatprep.subr.bf16.mxu1 %v4040_v47  ;;  %v3740_v9 = vpop.eup %3739 }
 0x41f   :  { %v2380_v51 = vmul.f32 %v3740_v9, %v4348_v39 }
 0x420   :  { %v3742_v11 = vpop.eup %3741 }
 0x421   :  { %v3744_v10 = vpop.eup %3743  ;;  %v2301_v8 = vpop.xlane.xlu0 %2300  ;;  %v2377_v28 = vmul.f32 %v3742_v11, %v4353_v25 }
 0x422   :  { %v3746_v21 = vpop.eup %3745  ;;  %v2379_v5 = vmul.f32 %v3744_v10, %v4344_v15 }
 0x423   :  { %v2304_v52 = vpop.xlane.xlu1 %2303  ;;  %v2378_v4 = vmul.f32 %v3746_v21, %v4358_v50 }
 0x424   :  { %3747 = vrcp.f32 %v2304_v52  ;;  %v2402_v2 = vpack.c.bf16 %v2380_v51, %v2379_v5 }
 0x425   :  { %v2295_v12 = vpop.xlane.xlu0 %2294  ;;  %v2401_v60 = vpack.c.bf16 %v2378_v4, %v2377_v28 }
 0x426   :  { %3749 = vrcp.f32 %v2295_v12 }
 0x427   :  { %3751 = vrcp.f32 %v2301_v8  ;;  %3383 = vmatprep.mubr.msk.bf16.mxu0 %vm2040_vm1, %v2401_v60  ;;  %v2298_v0 = vpop.xlane.xlu1 %2297 }
 0x428   :  { %3753 = vrcp.f32 %v2298_v0  ;;  %3384 = vmatmul.mubr.msk.bf16.vlgmr.msra.gmra.mrb[76].mxu0 %vm2040_vm1, %v2402_v2 }
 0x429   :  { %3396 = vmatpush3.bf16.msra.mxu0 %v4032_v20 }
 0x42a   :  { %3397 = vmatprep.subr.bf16.mxu0 %v4030_v19 }
 0x42d   :  { %3398 = vmatpush3.bf16.msra.mxu0 %v4030_v19 }
 0x42e   :  { %v3748_v39 = vpop.eup %3747 }
 0x42f   :  { %v2384_v54 = vmul.f32 %v3748_v39, %v4368_v59 }
 0x430   :  { %v3750_v15 = vpop.eup %3749 }
 0x431   :  { %v3752_v25 = vpop.eup %3751  ;;  %v2313_v50 = vpop.xlane.xlu0 %2312  ;;  %v2381_v42 = vmul.f32 %v3750_v15, %v4373_v37 }
 0x432   :  { %v3754_v49 = vpop.eup %3753  ;;  %v2383_v48 = vmul.f32 %v3752_v25, %v4364_v24 }
 0x433   :  { %v2316_v29 = vpop.xlane.xlu1 %2315  ;;  %v2382_v55 = vmul.f32 %v3754_v49, %v4378_v22 }
 0x434   :  { %3755 = vrcp.f32 %v2316_v29  ;;  %v2404_v14 = vpack.c.bf16 %v2384_v54, %v2383_v48 }
 0x435   :  { %v2307_v20 = vpop.xlane.xlu0 %2306  ;;  %v2403_v16 = vpack.c.bf16 %v2382_v55, %v2381_v42 }
 0x436   :  { %3757 = vrcp.f32 %v2307_v20 }
 0x437   :  { %3759 = vrcp.f32 %v2313_v50  ;;  %3391 = vmatprep.mubr.msk.bf16.mxu1 %vm2040_vm1, %v2403_v16  ;;  %v2310_v19 = vpop.xlane.xlu1 %2309 }
 0x438   :  { %3761 = vrcp.f32 %v2310_v19  ;;  %3392 = vmatmul.mubr.msk.bf16.vlgmr.msra.gmra.mrb[132].mxu1 %vm2040_vm1, %v2404_v14 }
 0x439   :  { %3404 = vmatpush3.bf16.msra.mxu1 %v4040_v47 }
 0x43a   :  { %3405 = vmatprep.subr.bf16.mxu1 %v4038_v40 }
 0x43d   :  { %3406 = vmatpush3.bf16.msra.mxu1 %v4038_v40 }
 0x43e   :  { %v3756_v59 = vpop.eup %3755 }
 0x43f   :  { %v2388_v35 = vmul.f32 %v3756_v59, %v4388_v44 }
 0x440   :  { %v3758_v24 = vpop.eup %3757 }
 0x441   :  { %v3760_v37 = vpop.eup %3759  ;;  %v2385_v1 = vmul.f32 %v3758_v24, %v4393_v18 }
 0x442   :  { %v3762_v22 = vpop.eup %3761  ;;  %v2319_v26 = vpop.xlane.xlu0 %2318  ;;  %v2387_v32 = vmul.f32 %v3760_v37, %v4384_v61 }
 0x443   :  { %3763 = vrcp.f32 %v2319_v26  ;;  %v2386_v33 = vmul.f32 %v3762_v22, %v4398_v41 }
 0x444   :  { %v2322_v34 = vpop.xlane.xlu1 %2321  ;;  %v2406_v13 = vpack.c.bf16 %v2388_v35, %v2387_v32 }
 0x445   :  { %3765 = vrcp.f32 %v2322_v34  ;;  %v2405_v47 = vpack.c.bf16 %v2386_v33, %v2385_v1 }
 0x446   :  { %v2325_v27 = vpop.xlane.xlu0 %2324 }
 0x447   :  { %3767 = vrcp.f32 %v2325_v27  ;;  %3399 = vmatprep.mubr.msk.bf16.mxu0 %vm2040_vm1, %v2405_v47 }
 0x448   :  { %3400 = vmatmul.mubr.msk.bf16.vlgmr.msra.gmra.mrb[80].mxu0 %vm2040_vm1, %v2406_v13  ;;  %v2328_v40 = vpop.xlane.xlu1 %2327 }
 0x449   :  { %3769 = vrcp.f32 %v2328_v40 }
 0x44d   :  { %v3764_v44 = vpop.eup %3763 }
 0x44e   :  { %v2389_v18 = vmul.f32 %v3764_v44, %v4404_v7 }
 0x44f   :  { %v3766_v3 = vpop.eup %3765 }
 0x450   :  { %v2390_v41 = vmul.f32 %v3766_v3, %v4408_v43 }
 0x451   :  { %v3768_v17 = vpop.eup %3767 }
 0x452   :  { %v2407_v61 = vpack.c.bf16 %v2390_v41, %v2389_v18  ;;  %v2391_v36 = vmul.f32 %v3768_v17, %v4412_v23 }
 0x453   :  { %v3770_v38 = vpop.eup %3769 }
 0x454   :  { %v2392_v62 = vmul.f32 %v3770_v38, %v4416_v30  ;;  %3407 = vmatprep.mubr.msk.bf16.mxu1 %vm2040_vm1, %v2407_v61 }
 0x456   :  { %v2408_v58 = vpack.c.bf16 %v2392_v62, %v2391_v36 }
 0x458   :  { %3408 = vmatmul.mubr.msk.bf16.vlgmr.msra.gmra.mrb[136].mxu1 %vm2040_vm1, %v2408_v58 }
 0x4bd   :  { %v3353_v63 = vpop.f32.mrb[68].mxu0 }
 0x4be   :  { %2851 = vst [vmem:[#allocation7 + $0x10] sm:$0xff] %v3353_v63  ;;  %v2449_v57 = vpop.f32.mrb[69].mxu0 }
 0x4bf   :  { %2849 = vst [vmem:[#allocation7] sm:$0xff] %v2449_v57  ;;  %v3354_v45 = vpop.f32.mrb[70].mxu0 }
 0x4c0   :  { %2852 = vst [vmem:[#allocation7 + $0x18] sm:$0xff] %v3354_v45  ;;  %v2452_v7 = vpop.f32.mrb[71].mxu0 }
 0x4c1   :  { %2850 = vst [vmem:[#allocation7 + $0x8] sm:$0xff] %v2452_v7 }
 0x4ce   :  { %v3361_v43 = vpop.f32.mrb[124].mxu1 }
 0x4cf   :  { %2855 = vst [vmem:[#allocation7 + $0x30] sm:$0xff] %v3361_v43  ;;  %v2504_v53 = vpop.f32.mrb[125].mxu1 }
 0x4d0   :  { %2853 = vst [vmem:[#allocation7 + $0x20] sm:$0xff] %v2504_v53  ;;  %v3362_v23 = vpop.f32.mrb[126].mxu1 }
 0x4d1   :  { %2856 = vst [vmem:[#allocation7 + $0x38] sm:$0xff] %v3362_v23  ;;  %v2507_v30 = vpop.f32.mrb[127].mxu1 }
 0x4d2   :  { %2854 = vst [vmem:[#allocation7 + $0x28] sm:$0xff] %v2507_v30 }
 0x4db   :  { %v3369_v56 = vpop.f32.mrb[72].mxu0 }
 0x4dc   :  { %2859 = vst [vmem:[#allocation7 + $0x50] sm:$0xff] %v3369_v56  ;;  %v2559_v46 = vpop.f32.mrb[73].mxu0 }
 0x4dd   :  { %2857 = vst [vmem:[#allocation7 + $0x40] sm:$0xff] %v2559_v46  ;;  %v3370_v31 = vpop.f32.mrb[74].mxu0 }
 0x4de   :  { %2860 = vst [vmem:[#allocation7 + $0x58] sm:$0xff] %v3370_v31  ;;  %v2562_v6 = vpop.f32.mrb[75].mxu0 }
 0x4df   :  { %2858 = vst [vmem:[#allocation7 + $0x48] sm:$0xff] %v2562_v6 }
 0x4eb   :  { %v3377_v9 = vpop.f32.mrb[128].mxu1 }
 0x4ec   :  { %2863 = vst [vmem:[#allocation7 + $0x70] sm:$0xff] %v3377_v9  ;;  %v2614_v11 = vpop.f32.mrb[129].mxu1 }
 0x4ed   :  { %2861 = vst [vmem:[#allocation7 + $0x60] sm:$0xff] %v2614_v11  ;;  %v3378_v10 = vpop.f32.mrb[130].mxu1 }
 0x4ee   :  { %2864 = vst [vmem:[#allocation7 + $0x78] sm:$0xff] %v3378_v10  ;;  %v2617_v8 = vpop.f32.mrb[131].mxu1 }
 0x4ef   :  { %2862 = vst [vmem:[#allocation7 + $0x68] sm:$0xff] %v2617_v8 }
 0x4fb   :  { %v3385_v21 = vpop.f32.mrb[76].mxu0 }
 0x4fc   :  { %2867 = vst [vmem:[#allocation7 + $0x90] sm:$0xff] %v3385_v21  ;;  %v2669_v51 = vpop.f32.mrb[77].mxu0 }
 0x4fd   :  { %2865 = vst [vmem:[#allocation7 + $0x80] sm:$0xff] %v2669_v51  ;;  %v3386_v52 = vpop.f32.mrb[78].mxu0 }
 0x4fe   :  { %2868 = vst [vmem:[#allocation7 + $0x98] sm:$0xff] %v3386_v52  ;;  %v2672_v28 = vpop.f32.mrb[79].mxu0 }
 0x4ff   :  { %2866 = vst [vmem:[#allocation7 + $0x88] sm:$0xff] %v2672_v28 }
 0x50b   :  { %v3393_v4 = vpop.f32.mrb[132].mxu1 }
 0x50c   :  { %2871 = vst [vmem:[#allocation7 + $0xb0] sm:$0xff] %v3393_v4  ;;  %v2724_v5 = vpop.f32.mrb[133].mxu1 }
 0x50d   :  { %2869 = vst [vmem:[#allocation7 + $0xa0] sm:$0xff] %v2724_v5  ;;  %v3394_v12 = vpop.f32.mrb[134].mxu1 }
 0x50e   :  { %2872 = vst [vmem:[#allocation7 + $0xb8] sm:$0xff] %v3394_v12  ;;  %v2727_v60 = vpop.f32.mrb[135].mxu1 }
 0x50f   :  { %2870 = vst [vmem:[#allocation7 + $0xa8] sm:$0xff] %v2727_v60 }
 0x51b   :  { %v3401_v2 = vpop.f32.mrb[80].mxu0 }
 0x51c   :  { %2875 = vst [vmem:[#allocation7 + $0xd0] sm:$0xff] %v3401_v2  ;;  %v2779_v0 = vpop.f32.mrb[81].mxu0 }
 0x51d   :  { %2873 = vst [vmem:[#allocation7 + $0xc0] sm:$0xff] %v2779_v0  ;;  %v3402_v39 = vpop.f32.mrb[82].mxu0 }
 0x51e   :  { %2876 = vst [vmem:[#allocation7 + $0xd8] sm:$0xff] %v3402_v39  ;;  %v2782_v15 = vpop.f32.mrb[83].mxu0 }
 0x51f   :  { %2874 = vst [vmem:[#allocation7 + $0xc8] sm:$0xff] %v2782_v15 }
 0x52b   :  { %v3409_v25 = vpop.f32.mrb[136].mxu1 }
 0x52c   :  { %2879 = vst [vmem:[#allocation7 + $0xf0] sm:$0xff] %v3409_v25  ;;  %v2834_v50 = vpop.f32.mrb[137].mxu1 }
 0x52d   :  { %2877 = vst [vmem:[#allocation7 + $0xe0] sm:$0xff] %v2834_v50  ;;  %v3410_v49 = vpop.f32.mrb[138].mxu1 }
 0x52e   :  { %2880 = vst [vmem:[#allocation7 + $0xf8] sm:$0xff] %v3410_v49  ;;  %v2837_v54 = vpop.f32.mrb[139].mxu1 }
 0x52f   :  { %2878 = vst [vmem:[#allocation7 + $0xe8] sm:$0xff] %v2837_v54 }
 0x530   :  { %3826 = shalt.err (!%p3823_p6)
}
 0x531   :  { %s3827_s10 = scalar_lea.hbm %s4504_s2, 4096 }
 0x532   :  { %p3828_p7 = scmp.ne.s32.totalorder %s4504_s2, %s3827_s10  ;;  %p3831_p8 = scmp.lt.u32.totalorder %s3827_s10, %s4504_s2 }
 0x534   :  { %p3833_p9 = pnand %p3831_p8, %p3828_p7 }
 0x536   :  { %3836 = shalt.err (!%p3833_p9)
}
 0x537   :  { %s3849_s15 = smov 128   ;;  %s3850_s16 = smov 8  }
 0x538   :  { %2892 = dma.vmem_to_hbm [thread:$0]  %s2887_s6, 4096, %s4504_s2, [#allocation4], %s3849_s15, %s3849_s15, %s3850_s16  }
 0x539   :  { %3841 = dma.done.wait [#allocation4], 4096  }
 0x53a   :  { %3842 = vsyncadd [#allocation4], 4294963200 }
 0x53b   :  { %2896 = vsyncpa [#allocation3], 1 }
 0x53c   :  { %2897 = vsyncpa [#allocation6], 1 }
 0x53d   :  { %2898 = vsyncpa [#allocation4], 1 }

</bundles_post_ra>
